<compile_context>
chip_gen: v7x
topology: tpu7x:2x2x1
jax: 0.10.0
libtpu: 0.0.40
codegen_flags: <defaults>
</compile_context>

<pallas_src>
import functools
import math

import jax
import jax.numpy as jnp
from jax.experimental import pallas as pl
from jax.experimental.pallas import tpu as pltpu


def _round_up(x, m):
    return ((x + m - 1) // m) * m


# ---------------------------------------------------------------------------
# Pallas kernel: weight-stationary (tm, K) @ (K, Cout) matmul with fused
# bias + LeakyReLU epilogue.  One jnp.dot per M tile, f32 accumulation on the
# MXU, output cast to the requested activation dtype.
# ---------------------------------------------------------------------------
def _mm_bias_act_kernel(p_ref, w_ref, b_ref, o_ref, *, neg_slope):
    acc = jnp.dot(p_ref[...], w_ref[...], preferred_element_type=jnp.float32)
    acc = acc + b_ref[...]
    if neg_slope is not None:
        acc = jnp.where(acc >= 0, acc, neg_slope * acc)
    o_ref[...] = acc.astype(o_ref.dtype)


def _matmul_bias_act(patches, w_mat, bias_row, neg_slope, out_dtype):
    """patches: (M, K) bf16, w_mat: (K, Cout) bf16, bias_row: (1, Cout) f32.

    Weight-stationary 1-D grid over M; the full weight / bias blocks use a
    constant index_map so they are DMA'd once and stay resident in VMEM.
    Only M is padded (to a multiple of 8-aligned tm); K and Cout are used at
    their natural sizes (full-array block dims).  Returns (M, Cout) out_dtype.
    """
    M, K = patches.shape
    Cout = w_mat.shape[1]

    # M tile: 8-aligned, capped at 512 (worst-case footprint with K=8192 bf16
    # LHS double-buffered is ~16 MiB, well under the 48 MiB VMEM budget and
    # within v7x's 64 MiB/TC).  If a large-M layer would collapse to a single
    # tile, split it so the "parallel" M axis can shard across v7x's 2 TCs.
    tm = min(512, _round_up(M, 8))
    if M >= 512 and _round_up(M, tm) // tm < 2:
        tm = _round_up(-(-M // 2), 8)
    Mp = _round_up(M, tm)

    patches_p = jnp.pad(patches, ((0, Mp - M), (0, 0)))

    grid = (Mp // tm,)
    kernel = functools.partial(_mm_bias_act_kernel, neg_slope=neg_slope)

    out_itemsize = jnp.dtype(out_dtype).itemsize
    flops = 2 * Mp * K * Cout
    # Weight-stationary: patches read once, weights/bias fetched once
    # (constant block index), output written once.
    bytes_accessed = (Mp * K * 2) + (K * Cout * 2) + (Cout * 4) \
        + (Mp * Cout * out_itemsize)

    out = pl.pallas_call(
        kernel,
        out_shape=jax.ShapeDtypeStruct((Mp, Cout), out_dtype),
        grid_spec=pltpu.PrefetchScalarGridSpec(
            num_scalar_prefetch=0,
            grid=grid,
            in_specs=[
                pl.BlockSpec((tm, K), lambda i: (i, 0)),      # LHS tile
                pl.BlockSpec((K, Cout), lambda i: (0, 0)),    # full weight
                pl.BlockSpec((1, Cout), lambda i: (0, 0)),    # bias row
            ],
            out_specs=pl.BlockSpec((tm, Cout), lambda i: (i, 0)),
        ),
        compiler_params=pltpu.CompilerParams(
            dimension_semantics=("parallel",),
            vmem_limit_bytes=48 * 1024 * 1024,
        ),
        cost_estimate=pl.CostEstimate(
            flops=flops, transcendentals=0, bytes_accessed=bytes_accessed),
    )(patches_p, w_mat, bias_row)
    return out[:M, :]


# ---------------------------------------------------------------------------
# Host-side glue: im2col (pure slicing / reshapes), spectral norm, conv wrapper
# ---------------------------------------------------------------------------
def _im2col(x_nhwc, ksize, stride, pad):
    x_p = jnp.pad(x_nhwc, ((0, 0), (pad, pad), (pad, pad), (0, 0)))
    N, Hp, Wp, C = x_p.shape
    Ho = (Hp - ksize) // stride + 1
    Wo = (Wp - ksize) // stride + 1
    cols = []
    for kh in range(ksize):
        for kw in range(ksize):
            cols.append(
                x_p[:, kh:kh + stride * Ho:stride, kw:kw + stride * Wo:stride, :]
            )
    # (N, Ho, Wo, kh*kw, C) -> (N*Ho*Wo, kh*kw*C)   [kh, kw outer; C inner]
    patches = jnp.stack(cols, axis=3)
    return patches.reshape(N * Ho * Wo, ksize * ksize * C), (N, Ho, Wo)


def _spectral_norm(w_oihw, u_key, n_power_iterations=1, eps=1e-12):
    out_c = w_oihw.shape[0]
    w_mat = w_oihw.reshape(out_c, -1)
    u = jax.random.normal(u_key, (out_c,), dtype=jnp.float32)
    u = u / (jnp.linalg.norm(u) + eps)
    v = None
    for _ in range(n_power_iterations):
        v = w_mat.T @ u
        v = v / (jnp.linalg.norm(v) + eps)
        u = w_mat @ v
        u = u / (jnp.linalg.norm(u) + eps)
    sigma = u @ (w_mat @ v)
    return w_oihw / sigma


def _conv2d(x_nhwc, w_oihw, bias, stride, pad, neg_slope, out_dtype):
    """Conv(kernel=4) as im2col + weight-stationary Pallas matmul. NHWC out."""
    ksize = w_oihw.shape[2]
    # bf16 patches halve the HBM bytes of the im2col matrix and feed the MXU
    # at its native rate; accumulation stays f32 inside the kernel.
    patches, (N, Ho, Wo) = _im2col(
        x_nhwc.astype(jnp.bfloat16), ksize, stride, pad)
    Cout = w_oihw.shape[0]
    # (Cout, Cin, kh, kw) -> (kh, kw, Cin, Cout) -> (kh*kw*Cin, Cout)
    w_mat = jnp.transpose(w_oihw, (2, 3, 1, 0)).reshape(-1, Cout)
    w_mat = w_mat.astype(jnp.bfloat16)
    if bias is None:
        bias_row = jnp.zeros((1, Cout), jnp.float32)
    else:
        bias_row = bias.reshape(1, Cout).astype(jnp.float32)
    out = _matmul_bias_act(patches, w_mat, bias_row, neg_slope, out_dtype)
    return out.reshape(N, Ho, Wo, Cout)


# ---------------------------------------------------------------------------
# Parameter construction (deterministic, mirrors init_conv in __init__)
# ---------------------------------------------------------------------------
_LAYER_STRIDES = (2, 2, 2, 1, 1)


def init_patchdis_params(key, ndf=64):
    cfg = [  # (in_c, out_c, bias)
        (3, ndf, True),
        (ndf, ndf * 2, True),
        (ndf * 2, ndf * 4, True),
        (ndf * 4, ndf * 8, True),
        (ndf * 8, 1, False),
    ]
    params = []
    for i, (cin, cout, has_bias) in enumerate(cfg):
        kw_, kb_, ku_ = jax.random.split(jax.random.fold_in(key, i), 3)
        k = 4
        n = k * k * cout
        w = jax.random.normal(kw_, (cout, cin, k, k), jnp.float32) * math.sqrt(2.0 / n)
        if has_bias:
            bound = 1.0 / math.sqrt(cin * k * k)
            b = jax.random.uniform(kb_, (cout,), jnp.float32, -bound, bound)
        else:
            b = None
        params.append(dict(w=w, b=b, u_key=ku_))
    return params


# ---------------------------------------------------------------------------
# Forward pass (PatchDis, use_self_attn=False)
# ---------------------------------------------------------------------------
def _patchdis_forward_impl(x_nchw, params):
    # NCHW (PyTorch) -> NHWC (internal)
    h = jnp.transpose(x_nchw, (0, 2, 3, 1)).astype(jnp.float32)
    n_layers = len(params)
    for i, p in enumerate(params):
        w_sn = _spectral_norm(p["w"], p["u_key"])
        is_last = i == n_layers - 1
        neg_slope = None if is_last else 0.01
        # Intermediate activations stay bf16 (next layer consumes bf16
        # patches anyway); final logits are emitted in f32.
        out_dtype = jnp.float32 if is_last else jnp.bfloat16
        h = _conv2d(h, w_sn, p["b"], stride=_LAYER_STRIDES[i], pad=1,
                    neg_slope=neg_slope, out_dtype=out_dtype)
    # back to NCHW then squeeze (matches h.squeeze())
    h = jnp.transpose(h, (0, 3, 1, 2))
    return jnp.squeeze(h)


patchdis_forward = jax.jit(_patchdis_forward_impl)


if __name__ == "__main__":
    key = jax.random.PRNGKey(0)
    kx, kp = jax.random.split(key)

    # small shapes: batch=2, 3 input channels, 32x32 spatial, ndf=8
    x = jax.random.normal(kx, (2, 3, 32, 32), jnp.float32)
    params = init_patchdis_params(kp, ndf=8)

    out = patchdis_forward(x, params)
    out = jax.block_until_ready(out)

    # 32 -> 16 -> 8 -> 4 -> 3 -> 2 ; channel dim of size 1 squeezed away
    assert out.shape == (2, 2, 2), out.shape
    assert out.dtype == jnp.float32
    assert bool(jnp.all(jnp.isfinite(out)))
    print("KERNEL_OK")
</pallas_src>

<mosaic_0001>
module attributes {stable_mosaic.version = 11 : i64} {
  func.func @_mm_bias_act_kernel(%arg0: i32, %arg1: memref<256x48xbf16, #tpu.memory_space<vmem>>, %arg2: memref<48x8xbf16, #tpu.memory_space<vmem>>, %arg3: memref<1x8xf32, #tpu.memory_space<vmem>>, %arg4: memref<256x8xbf16, #tpu.memory_space<vmem>>) attributes {dimension_semantics = [#tpu.dimension_semantics<parallel>], iteration_bounds = array<i64: 2>, scalar_prefetch = 0 : i64, scratch_operands = 0 : i64, tpu.core_type = #tpu.core_type<tc>, window_params = [{transform_indices = @transform_0, window_bounds = array<i64: 256, 48>}, {pipeline_mode = #tpu.pipeline_mode<synchronous>, transform_indices = @transform_1, window_bounds = array<i64: 48, 8>}, {pipeline_mode = #tpu.pipeline_mode<synchronous>, transform_indices = @transform_2, window_bounds = array<i64: 1, 8>}, {transform_indices = @transform_3, window_bounds = array<i64: 256, 8>}]} {
    %c0 = arith.constant 0 : index
    %c0_0 = arith.constant 0 : index
    %0 = vector.load %arg1[%c0, %c0_0] : memref<256x48xbf16, #tpu.memory_space<vmem>>, vector<256x48xbf16>
    %c0_1 = arith.constant 0 : index
    %c0_2 = arith.constant 0 : index
    %1 = vector.load %arg2[%c0_1, %c0_2] : memref<48x8xbf16, #tpu.memory_space<vmem>>, vector<48x8xbf16>
    %cst = arith.constant dense<0.000000e+00> : vector<256x8xf32>
    %2 = tpu.matmul %0, %1, %cst {dimension_numbers = #tpu.dot_dimension_numbers<[1], [0], [0], [1], [0, 0, 1, 1], [], []>} : vector<256x48xbf16>, vector<48x8xbf16>, vector<256x8xf32> -> vector<256x8xf32>
    %c0_3 = arith.constant 0 : index
    %c0_4 = arith.constant 0 : index
    %3 = vector.load %arg3[%c0_3, %c0_4] : memref<1x8xf32, #tpu.memory_space<vmem>>, vector<1x8xf32>
    %4 = vector.broadcast %3 : vector<1x8xf32> to vector<256x8xf32>
    %5 = arith.addf %2, %4 : vector<256x8xf32>
    %cst_5 = arith.constant 0.000000e+00 : f32
    %6 = vector.broadcast %cst_5 : f32 to vector<256x8xf32>
    %7 = arith.cmpf oge, %5, %6 : vector<256x8xf32>
    %cst_6 = arith.constant 0.00999999977 : f32
    %8 = vector.broadcast %cst_6 : f32 to vector<256x8xf32>
    %9 = arith.mulf %8, %5 : vector<256x8xf32>
    %10 = arith.select %7, %5, %9 : vector<256x8xi1>, vector<256x8xf32>
    %11 = arith.truncf %10 : vector<256x8xf32> to vector<256x8xbf16>
    %c0_7 = arith.constant 0 : index
    %c0_8 = arith.constant 0 : index
    %12 = vector.load %arg4[%c0_7, %c0_8] : memref<256x8xbf16, #tpu.memory_space<vmem>>, vector<256x8xbf16>
    tpu.vector_store %arg4[%c0_7, %c0_8], %11 {strides = array<i32>} : memref<256x8xbf16, #tpu.memory_space<vmem>>, vector<256x8xbf16>,
    return
  }
  func.func @transform_0(%arg0: i32) -> (i32, i32) {
    %c0_i32 = arith.constant 0 : i32
    %c0_i32_0 = arith.constant 0 : i32
    return %arg0, %c0_i32 : i32, i32
  }
  func.func @transform_1(%arg0: i32) -> (i32, i32) {
    %c0_i32 = arith.constant 0 : i32
    %c0_i32_0 = arith.constant 0 : i32
    %c0_i32_1 = arith.constant 0 : i32
    return %c0_i32, %c0_i32_0 : i32, i32
  }
  func.func @transform_2(%arg0: i32) -> (i32, i32) {
    %c0_i32 = arith.constant 0 : i32
    %c0_i32_0 = arith.constant 0 : i32
    %c0_i32_1 = arith.constant 0 : i32
    return %c0_i32, %c0_i32_0 : i32, i32
  }
  func.func @transform_3(%arg0: i32) -> (i32, i32) {
    %c0_i32 = arith.constant 0 : i32
    %c0_i32_0 = arith.constant 0 : i32
    return %arg0, %c0_i32 : i32, i32
  }
}

module attributes {stable_mosaic.version = 11 : i64} {
  func.func @_mm_bias_act_kernel(%arg0: i32, %arg1: memref<128x128xbf16, #tpu.memory_space<vmem>>, %arg2: memref<128x16xbf16, #tpu.memory_space<vmem>>, %arg3: memref<1x16xf32, #tpu.memory_space<vmem>>, %arg4: memref<128x16xbf16, #tpu.memory_space<vmem>>) attributes {dimension_semantics = [#tpu.dimension_semantics<parallel>], iteration_bounds = array<i64: 1>, scalar_prefetch = 0 : i64, scratch_operands = 0 : i64, tpu.core_type = #tpu.core_type<tc>, window_params = [{transform_indices = @transform_0, window_bounds = array<i64: 128, 128>}, {pipeline_mode = #tpu.pipeline_mode<synchronous>, transform_indices = @transform_1, window_bounds = array<i64: 128, 16>}, {pipeline_mode = #tpu.pipeline_mode<synchronous>, transform_indices = @transform_2, window_bounds = array<i64: 1, 16>}, {transform_indices = @transform_3, window_bounds = array<i64: 128, 16>}]} {
    %c0 = arith.constant 0 : index
    %c0_0 = arith.constant 0 : index
    %0 = vector.load %arg1[%c0, %c0_0] : memref<128x128xbf16, #tpu.memory_space<vmem>>, vector<128x128xbf16>
    %c0_1 = arith.constant 0 : index
    %c0_2 = arith.constant 0 : index
    %1 = vector.load %arg2[%c0_1, %c0_2] : memref<128x16xbf16, #tpu.memory_space<vmem>>, vector<128x16xbf16>
    %cst = arith.constant dense<0.000000e+00> : vector<128x16xf32>
    %2 = tpu.matmul %0, %1, %cst {dimension_numbers = #tpu.dot_dimension_numbers<[1], [0], [0], [1], [0, 0, 1, 1], [], []>} : vector<128x128xbf16>, vector<128x16xbf16>, vector<128x16xf32> -> vector<128x16xf32>
    %c0_3 = arith.constant 0 : index
    %c0_4 = arith.constant 0 : index
    %3 = vector.load %arg3[%c0_3, %c0_4] : memref<1x16xf32, #tpu.memory_space<vmem>>, vector<1x16xf32>
    %4 = vector.broadcast %3 : vector<1x16xf32> to vector<128x16xf32>
    %5 = arith.addf %2, %4 : vector<128x16xf32>
    %cst_5 = arith.constant 0.000000e+00 : f32
    %6 = vector.broadcast %cst_5 : f32 to vector<128x16xf32>
    %7 = arith.cmpf oge, %5, %6 : vector<128x16xf32>
    %cst_6 = arith.constant 0.00999999977 : f32
    %8 = vector.broadcast %cst_6 : f32 to vector<128x16xf32>
    %9 = arith.mulf %8, %5 : vector<128x16xf32>
    %10 = arith.select %7, %5, %9 : vector<128x16xi1>, vector<128x16xf32>
    %11 = arith.truncf %10 : vector<128x16xf32> to vector<128x16xbf16>
    %c0_7 = arith.constant 0 : index
    %c0_8 = arith.constant 0 : index
    %12 = vector.load %arg4[%c0_7, %c0_8] : memref<128x16xbf16, #tpu.memory_space<vmem>>, vector<128x16xbf16>
    tpu.vector_store %arg4[%c0_7, %c0_8], %11 {strides = array<i32>} : memref<128x16xbf16, #tpu.memory_space<vmem>>, vector<128x16xbf16>,
    return
  }
  func.func @transform_0(%arg0: i32) -> (i32, i32) {
    %c0_i32 = arith.constant 0 : i32
    %c0_i32_0 = arith.constant 0 : i32
    return %arg0, %c0_i32 : i32, i32
  }
  func.func @transform_1(%arg0: i32) -> (i32, i32) {
    %c0_i32 = arith.constant 0 : i32
    %c0_i32_0 = arith.constant 0 : i32
    %c0_i32_1 = arith.constant 0 : i32
    return %c0_i32, %c0_i32_0 : i32, i32
  }
  func.func @transform_2(%arg0: i32) -> (i32, i32) {
    %c0_i32 = arith.constant 0 : i32
    %c0_i32_0 = arith.constant 0 : i32
    %c0_i32_1 = arith.constant 0 : i32
    return %c0_i32, %c0_i32_0 : i32, i32
  }
  func.func @transform_3(%arg0: i32) -> (i32, i32) {
    %c0_i32 = arith.constant 0 : i32
    %c0_i32_0 = arith.constant 0 : i32
    return %arg0, %c0_i32 : i32, i32
  }
}

module attributes {stable_mosaic.version = 11 : i64} {
  func.func @_mm_bias_act_kernel(%arg0: i32, %arg1: memref<32x256xbf16, #tpu.memory_space<vmem>>, %arg2: memref<256x32xbf16, #tpu.memory_space<vmem>>, %arg3: memref<1x32xf32, #tpu.memory_space<vmem>>, %arg4: memref<32x32xbf16, #tpu.memory_space<vmem>>) attributes {dimension_semantics = [#tpu.dimension_semantics<parallel>], iteration_bounds = array<i64: 1>, scalar_prefetch = 0 : i64, scratch_operands = 0 : i64, tpu.core_type = #tpu.core_type<tc>, window_params = [{transform_indices = @transform_0, window_bounds = array<i64: 32, 256>}, {pipeline_mode = #tpu.pipeline_mode<synchronous>, transform_indices = @transform_1, window_bounds = array<i64: 256, 32>}, {pipeline_mode = #tpu.pipeline_mode<synchronous>, transform_indices = @transform_2, window_bounds = array<i64: 1, 32>}, {transform_indices = @transform_3, window_bounds = array<i64: 32, 32>}]} {
    %c0 = arith.constant 0 : index
    %c0_0 = arith.constant 0 : index
    %0 = vector.load %arg1[%c0, %c0_0] : memref<32x256xbf16, #tpu.memory_space<vmem>>, vector<32x256xbf16>
    %c0_1 = arith.constant 0 : index
    %c0_2 = arith.constant 0 : index
    %1 = vector.load %arg2[%c0_1, %c0_2] : memref<256x32xbf16, #tpu.memory_space<vmem>>, vector<256x32xbf16>
    %cst = arith.constant dense<0.000000e+00> : vector<32x32xf32>
    %2 = tpu.matmul %0, %1, %cst {dimension_numbers = #tpu.dot_dimension_numbers<[1], [0], [0], [1], [0, 0, 1, 1], [], []>} : vector<32x256xbf16>, vector<256x32xbf16>, vector<32x32xf32> -> vector<32x32xf32>
    %c0_3 = arith.constant 0 : index
    %c0_4 = arith.constant 0 : index
    %3 = vector.load %arg3[%c0_3, %c0_4] : memref<1x32xf32, #tpu.memory_space<vmem>>, vector<1x32xf32>
    %4 = vector.broadcast %3 : vector<1x32xf32> to vector<32x32xf32>
    %5 = arith.addf %2, %4 : vector<32x32xf32>
    %cst_5 = arith.constant 0.000000e+00 : f32
    %6 = vector.broadcast %cst_5 : f32 to vector<32x32xf32>
    %7 = arith.cmpf oge, %5, %6 : vector<32x32xf32>
    %cst_6 = arith.constant 0.00999999977 : f32
    %8 = vector.broadcast %cst_6 : f32 to vector<32x32xf32>
    %9 = arith.mulf %8, %5 : vector<32x32xf32>
    %10 = arith.select %7, %5, %9 : vector<32x32xi1>, vector<32x32xf32>
    %11 = arith.truncf %10 : vector<32x32xf32> to vector<32x32xbf16>
    %c0_7 = arith.constant 0 : index
    %c0_8 = arith.constant 0 : index
    %12 = vector.load %arg4[%c0_7, %c0_8] : memref<32x32xbf16, #tpu.memory_space<vmem>>, vector<32x32xbf16>
    tpu.vector_store %arg4[%c0_7, %c0_8], %11 {strides = array<i32>} : memref<32x32xbf16, #tpu.memory_space<vmem>>, vector<32x32xbf16>,
    return
  }
  func.func @transform_0(%arg0: i32) -> (i32, i32) {
    %c0_i32 = arith.constant 0 : i32
    %c0_i32_0 = arith.constant 0 : i32
    return %arg0, %c0_i32 : i32, i32
  }
  func.func @transform_1(%arg0: i32) -> (i32, i32) {
    %c0_i32 = arith.constant 0 : i32
    %c0_i32_0 = arith.constant 0 : i32
    %c0_i32_1 = arith.constant 0 : i32
    return %c0_i32, %c0_i32_0 : i32, i32
  }
  func.func @transform_2(%arg0: i32) -> (i32, i32) {
    %c0_i32 = arith.constant 0 : i32
    %c0_i32_0 = arith.constant 0 : i32
    %c0_i32_1 = arith.constant 0 : i32
    return %c0_i32, %c0_i32_0 : i32, i32
  }
  func.func @transform_3(%arg0: i32) -> (i32, i32) {
    %c0_i32 = arith.constant 0 : i32
    %c0_i32_0 = arith.constant 0 : i32
    return %arg0, %c0_i32 : i32, i32
  }
}

module attributes {stable_mosaic.version = 11 : i64} {
  func.func @_mm_bias_act_kernel(%arg0: i32, %arg1: memref<24x512xbf16, #tpu.memory_space<vmem>>, %arg2: memref<512x64xbf16, #tpu.memory_space<vmem>>, %arg3: memref<1x64xf32, #tpu.memory_space<vmem>>, %arg4: memref<24x64xbf16, #tpu.memory_space<vmem>>) attributes {dimension_semantics = [#tpu.dimension_semantics<parallel>], iteration_bounds = array<i64: 1>, scalar_prefetch = 0 : i64, scratch_operands = 0 : i64, tpu.core_type = #tpu.core_type<tc>, window_params = [{transform_indices = @transform_0, window_bounds = array<i64: 24, 512>}, {pipeline_mode = #tpu.pipeline_mode<synchronous>, transform_indices = @transform_1, window_bounds = array<i64: 512, 64>}, {pipeline_mode = #tpu.pipeline_mode<synchronous>, transform_indices = @transform_2, window_bounds = array<i64: 1, 64>}, {transform_indices = @transform_3, window_bounds = array<i64: 24, 64>}]} {
    %c0 = arith.constant 0 : index
    %c0_0 = arith.constant 0 : index
    %0 = vector.load %arg1[%c0, %c0_0] : memref<24x512xbf16, #tpu.memory_space<vmem>>, vector<24x512xbf16>
    %c0_1 = arith.constant 0 : index
    %c0_2 = arith.constant 0 : index
    %1 = vector.load %arg2[%c0_1, %c0_2] : memref<512x64xbf16, #tpu.memory_space<vmem>>, vector<512x64xbf16>
    %cst = arith.constant dense<0.000000e+00> : vector<24x64xf32>
    %2 = tpu.matmul %0, %1, %cst {dimension_numbers = #tpu.dot_dimension_numbers<[1], [0], [0], [1], [0, 0, 1, 1], [], []>} : vector<24x512xbf16>, vector<512x64xbf16>, vector<24x64xf32> -> vector<24x64xf32>
    %c0_3 = arith.constant 0 : index
    %c0_4 = arith.constant 0 : index
    %3 = vector.load %arg3[%c0_3, %c0_4] : memref<1x64xf32, #tpu.memory_space<vmem>>, vector<1x64xf32>
    %4 = vector.broadcast %3 : vector<1x64xf32> to vector<24x64xf32>
    %5 = arith.addf %2, %4 : vector<24x64xf32>
    %cst_5 = arith.constant 0.000000e+00 : f32
    %6 = vector.broadcast %cst_5 : f32 to vector<24x64xf32>
    %7 = arith.cmpf oge, %5, %6 : vector<24x64xf32>
    %cst_6 = arith.constant 0.00999999977 : f32
    %8 = vector.broadcast %cst_6 : f32 to vector<24x64xf32>
    %9 = arith.mulf %8, %5 : vector<24x64xf32>
    %10 = arith.select %7, %5, %9 : vector<24x64xi1>, vector<24x64xf32>
    %11 = arith.truncf %10 : vector<24x64xf32> to vector<24x64xbf16>
    %c0_7 = arith.constant 0 : index
    %c0_8 = arith.constant 0 : index
    %12 = vector.load %arg4[%c0_7, %c0_8] : memref<24x64xbf16, #tpu.memory_space<vmem>>, vector<24x64xbf16>
    tpu.vector_store %arg4[%c0_7, %c0_8], %11 {strides = array<i32>} : memref<24x64xbf16, #tpu.memory_space<vmem>>, vector<24x64xbf16>,
    return
  }
  func.func @transform_0(%arg0: i32) -> (i32, i32) {
    %c0_i32 = arith.constant 0 : i32
    %c0_i32_0 = arith.constant 0 : i32
    return %arg0, %c0_i32 : i32, i32
  }
  func.func @transform_1(%arg0: i32) -> (i32, i32) {
    %c0_i32 = arith.constant 0 : i32
    %c0_i32_0 = arith.constant 0 : i32
    %c0_i32_1 = arith.constant 0 : i32
    return %c0_i32, %c0_i32_0 : i32, i32
  }
  func.func @transform_2(%arg0: i32) -> (i32, i32) {
    %c0_i32 = arith.constant 0 : i32
    %c0_i32_0 = arith.constant 0 : i32
    %c0_i32_1 = arith.constant 0 : i32
    return %c0_i32, %c0_i32_0 : i32, i32
  }
  func.func @transform_3(%arg0: i32) -> (i32, i32) {
    %c0_i32 = arith.constant 0 : i32
    %c0_i32_0 = arith.constant 0 : i32
    return %arg0, %c0_i32 : i32, i32
  }
}

module attributes {stable_mosaic.version = 11 : i64} {
  func.func @_mm_bias_act_kernel(%arg0: i32, %arg1: memref<8x1024xbf16, #tpu.memory_space<vmem>>, %arg2: memref<1024x1xbf16, #tpu.memory_space<vmem>>, %arg3: memref<1x1xf32, #tpu.memory_space<vmem>>, %arg4: memref<8x1xf32, #tpu.memory_space<vmem>>) attributes {dimension_semantics = [#tpu.dimension_semantics<parallel>], iteration_bounds = array<i64: 1>, scalar_prefetch = 0 : i64, scratch_operands = 0 : i64, tpu.core_type = #tpu.core_type<tc>, window_params = [{transform_indices = @transform_0, window_bounds = array<i64: 8, 1024>}, {pipeline_mode = #tpu.pipeline_mode<synchronous>, transform_indices = @transform_1, window_bounds = array<i64: 1024, 1>}, {pipeline_mode = #tpu.pipeline_mode<synchronous>, transform_indices = @transform_2, window_bounds = array<i64: 1, 1>}, {transform_indices = @transform_3, window_bounds = array<i64: 8, 1>}]} {
    %c0 = arith.constant 0 : index
    %c0_0 = arith.constant 0 : index
    %0 = vector.load %arg1[%c0, %c0_0] : memref<8x1024xbf16, #tpu.memory_space<vmem>>, vector<8x1024xbf16>
    %c0_1 = arith.constant 0 : index
    %c0_2 = arith.constant 0 : index
    %1 = vector.load %arg2[%c0_1, %c0_2] : memref<1024x1xbf16, #tpu.memory_space<vmem>>, vector<1024x1xbf16>
    %cst = arith.constant dense<0.000000e+00> : vector<8x1xf32>
    %2 = tpu.matmul %0, %1, %cst {dimension_numbers = #tpu.dot_dimension_numbers<[1], [0], [0], [1], [0, 0, 1, 1], [], []>} : vector<8x1024xbf16>, vector<1024x1xbf16>, vector<8x1xf32> -> vector<8x1xf32>
    %c0_3 = arith.constant 0 : index
    %c0_4 = arith.constant 0 : index
    %3 = vector.load %arg3[%c0_3, %c0_4] : memref<1x1xf32, #tpu.memory_space<vmem>>, vector<1x1xf32>
    %4 = vector.broadcast %3 : vector<1x1xf32> to vector<8x1xf32>
    %5 = arith.addf %2, %4 : vector<8x1xf32>
    %c0_5 = arith.constant 0 : index
    %c0_6 = arith.constant 0 : index
    %6 = vector.load %arg4[%c0_5, %c0_6] : memref<8x1xf32, #tpu.memory_space<vmem>>, vector<8x1xf32>
    tpu.vector_store %arg4[%c0_5, %c0_6], %5 {strides = array<i32>} : memref<8x1xf32, #tpu.memory_space<vmem>>, vector<8x1xf32>,
    return
  }
  func.func @transform_0(%arg0: i32) -> (i32, i32) {
    %c0_i32 = arith.constant 0 : i32
    %c0_i32_0 = arith.constant 0 : i32
    return %arg0, %c0_i32 : i32, i32
  }
  func.func @transform_1(%arg0: i32) -> (i32, i32) {
    %c0_i32 = arith.constant 0 : i32
    %c0_i32_0 = arith.constant 0 : i32
    %c0_i32_1 = arith.constant 0 : i32
    return %c0_i32, %c0_i32_0 : i32, i32
  }
  func.func @transform_2(%arg0: i32) -> (i32, i32) {
    %c0_i32 = arith.constant 0 : i32
    %c0_i32_0 = arith.constant 0 : i32
    %c0_i32_1 = arith.constant 0 : i32
    return %c0_i32, %c0_i32_0 : i32, i32
  }
  func.func @transform_3(%arg0: i32) -> (i32, i32) {
    %c0_i32 = arith.constant 0 : i32
    %c0_i32_0 = arith.constant 0 : i32
    return %arg0, %c0_i32 : i32, i32
  }
}

</mosaic_0001>

<bundles_post_ra>
// kernel: _patchdis_forward_impl.5
= control target key start
LH: loop header
LB: loop body
LE: loop exit
PB: predicated region body
PF: predicated region fallthrough
CT: control target
= control target key end

     0   :  { %s1070_s12 = smov 0   ;;  %s1241_s0 = inlined_call_operand.vmem [shape: bf16[512,48], index: 0, kind: input, shape index: {}]   ;;  %s1242_s1 = inlined_call_operand.vmem [shape: bf16[48,8], index: 1, kind: input, shape index: {}]   ;;  %s1243_s2 = inlined_call_operand.vmem [shape: f32[1,8], index: 2, kind: input, shape index: {}]   ;;  %s1244_s3 = inlined_call_operand.vmem [shape: bf16[512,8], index: 3, kind: output, shape index: {}]  }
   0x1 LB: > { %s841_s13 = sadd.s32 4294967295, %s1048_s12   ;;  %p845_p0 = scmp.ge.s32.totalorder %s1048_s12, 1  ;;  %s1048_s12 = sphi %s1070_s12, %s13_s12  }
   0x2   : > { %p138_p1 = scmp.lt.s32.totalorder %s1048_s12, 3 }
   0x4   : > { %p139_p2 = pnand %p845_p0, %p138_p1 }
   0x5   : > { %v1023_v0 = vld [vmem:[%s1242_s1] sm:$0xff] (!%p139_p2)   ;;  %s846_s16 = sshll.u32 (!%p139_p2), %s841_s13, 5  ;;  %v1024_v1 = vld [vmem:[%s1242_s1 + $0x8] sm:$0xff] (!%p139_p2)   ;;  %v1025_v2 = vld [vmem:[%s1242_s1 + $0x10] sm:$0xff] (!%p139_p2)   ;;  %vm318_vm0 = vcmask (!%p139_p2), 392192   ;;  %vm752_vm1 = vcmask (!%p139_p2), 60416  }
   0x6   : > { %142 = sbr.rel (%p139_p2) target bundleno = 278 (0x116), region = 32  ;;  %p163_p3 = scmp.lt.s32.totalorder (!%p139_p2), %s846_s16, 63  ;;  %971 = vmatprep.subr.bf16.mxu0 (!%p139_p2), %v1023_v0  ;;  %1009 = vmatprep.subr.bf16.mxu1 (!%p139_p2), %v1023_v0  ;;  %v1132_v19 = vld [vmem:[%s1243_s2] ss:$0 sm:$0xff] (!%p139_p2) }
   0x7   : > { %972 = vmatpush3.bf16.msra.mxu0 (!%p139_p2), %v1023_v0  ;;  %1012 = vmatpush3.bf16.msra.mxu1 (!%p139_p2), %v1023_v0 }
   0x8   : > { %973 = vmatprep.subr.bf16.mxu0 (!%p139_p2), %v1024_v1  ;;  %1010 = vmatprep.subr.bf16.mxu1 (!%p139_p2), %v1024_v1 }
   0xb   : > { %974 = vmatpush3.bf16.msra.mxu0 (!%p139_p2), %v1024_v1  ;;  %1013 = vmatpush3.bf16.msra.mxu1 (!%p139_p2), %v1024_v1 }
   0xc   : > { %975 = vmatprep.subr.bf16.mxu0 (!%p139_p2), %v1025_v2  ;;  %1011 = vmatprep.subr.bf16.mxu1 (!%p139_p2), %v1025_v2 }
   0xd   : > { %s1246_s16 = smov (!%p163_p3, %s846_s16), 63 }
   0xe   : > { %s847_s21 = sshll.u32 %s1246_s16, 2 }
   0xf   : > { %s1095_s24 = scalar_lea.vmem %s1241_s0, %s847_s21  ;;  %976 = vmatpush3.bf16.msra.mxu0 %v1025_v2  ;;  %1014 = vmatpush3.bf16.msra.mxu1 %v1025_v2  ;;  %s1143_s29 = scalar_lea.vmem %s1244_s3, %s847_s21 }
  0x10   : > { %v1026_v3 = vld [vmem:[%s1095_s24] sm:$0xff]   ;;  %v1028_v5 = vld [vmem:[%s1095_s24 + $0x8] sm:$0xff]   ;;  %v1030_v7 = vld [vmem:[%s1095_s24 + $0x10] sm:$0xff]  }
  0x11   : > { %v1027_v4 = vld [vmem:[%s1095_s24 + $0x40] sm:$0xff]   ;;  %977 = vmatprep.mubr.msk.bf16.mxu0 %vm318_vm0, %v1026_v3  ;;  %v1029_v6 = vld [vmem:[%s1095_s24 + $0x48] sm:$0xff]   ;;  %v1031_v8 = vld [vmem:[%s1095_s24 + $0x50] sm:$0xff]  }
  0x12   : > { %993 = vmatprep.mubr.msk.bf16.mxu1 %vm318_vm0, %v1027_v4  ;;  %978 = vmatmul.mubr.msk.bf16.vlgmr.msra.gmra.mrb[0].mxu0 %vm318_vm0, %v1028_v5  ;;  %v1032_v9 = vld [vmem:[%s1095_s24 + $0x18] sm:$0xff]   ;;  %v1034_v11 = vld [vmem:[%s1095_s24 + $0x20] sm:$0xff]   ;;  %v1036_v13 = vld [vmem:[%s1095_s24 + $0x28] sm:$0xff]  }
  0x13   : > { %994 = vmatmul.mubr.msk.bf16.vlgmr.msra.gmra.mrb[0].mxu1 %vm318_vm0, %v1029_v6  ;;  %981 = vmatprep.mubr.msk.bf16.mxu0 %vm318_vm0, %v1030_v7  ;;  %v1033_v10 = vld [vmem:[%s1095_s24 + $0x58] sm:$0xff]   ;;  %v1035_v12 = vld [vmem:[%s1095_s24 + $0x60] sm:$0xff]   ;;  %v1037_v14 = vld [vmem:[%s1095_s24 + $0x68] sm:$0xff]  }
  0x14   : > { %997 = vmatprep.mubr.msk.bf16.mxu1 %vm318_vm0, %v1031_v8  ;;  %v1038_v15 = vld [vmem:[%s1095_s24 + $0x30] sm:$0xff]   ;;  %v1040_v17 = vld [vmem:[%s1095_s24 + $0x38] sm:$0xff]  }
  0x15   : > { %v1039_v16 = vld [vmem:[%s1095_s24 + $0x70] sm:$0xff]   ;;  %v1041_v18 = vld [vmem:[%s1095_s24 + $0x78] sm:$0xff]  }
  0x1a   : > { %982 = vmatmul.mubr.msk.bf16.gmra.mrb[4].mxu0 %vm318_vm0, %v1032_v9 }
  0x1b   : > { %998 = vmatmul.mubr.msk.bf16.gmra.mrb[4].mxu1 %vm318_vm0, %v1033_v10  ;;  %985 = vmatprep.mubr.msk.bf16.mxu0 %vm318_vm0, %v1034_v11 }
  0x1c   : > { %1001 = vmatprep.mubr.msk.bf16.mxu1 %vm318_vm0, %v1035_v12 }
  0x22   : > { %986 = vmatmul.mubr.msk.bf16.gmra.mrb[8].mxu0 %vm318_vm0, %v1036_v13 }
  0x23   : > { %1002 = vmatmul.mubr.msk.bf16.gmra.mrb[8].mxu1 %vm318_vm0, %v1037_v14  ;;  %989 = vmatprep.mubr.msk.bf16.mxu0 %vm318_vm0, %v1038_v15 }
  0x24   : > { %1005 = vmatprep.mubr.msk.bf16.mxu1 %vm318_vm0, %v1039_v16 }
  0x2a   : > { %990 = vmatmul.mubr.msk.bf16.gmra.mrb[12].mxu0 %vm318_vm0, %v1040_v17 }
  0x2b   : > { %1006 = vmatmul.mubr.msk.bf16.gmra.mrb[12].mxu1 %vm318_vm0, %v1041_v18 }
  0xe5   : > { %v979_v20 = vpop.f32.mrb[0].mxu0 }
  0xe6   : > { %v995_v21 = vpop.f32.mrb[0].mxu1  ;;  %v410_v22 = vadd.f32 %v979_v20, %v1132_v19  ;;  %v401_v24 = vpop.f32.mrb[1].mxu0 }
  0xe7   : > { %v474_v23 = vadd.f32 %v995_v21, %v1132_v19  ;;  %v465_v25 = vpop.f32.mrb[1].mxu1  ;;  %v402_v26 = vadd.f32 %v1132_v19, %v401_v24  ;;  %v980_v28 = vpop.f32.mrb[2].mxu0 }
  0xe8   : > { %v466_v27 = vadd.f32 %v1132_v19, %v465_v25  ;;  %v996_v29 = vpop.f32.mrb[2].mxu1  ;;  %vm530_vm2 = vcmp.ge.f32.partialorder %v410_v22, 0.0  ;;  %v562_v30 = vmul.f32 0.01, %v410_v22  ;;  %v413_v36 = vadd.f32 %v980_v28, %v1132_v19  ;;  %v404_v38 = vpop.f32.mrb[3].mxu0 }
  0xe9   : > { %vm546_vm3 = vcmp.ge.f32.partialorder %v474_v23, 0.0  ;;  %v578_v31 = vmul.f32 0.01, %v474_v23  ;;  %vm528_vm4 = vcmp.ge.f32.partialorder %v402_v26, 0.0  ;;  %v560_v32 = vmul.f32 0.01, %v402_v26 }
  0xea   : > { %vm544_vm5 = vcmp.ge.f32.partialorder %v466_v27, 0.0  ;;  %v576_v33 = vmul.f32 0.01, %v466_v27  ;;  %v594_v34 = vsel %vm530_vm2, %v410_v22, %v562_v30  ;;  %v477_v37 = vadd.f32 %v996_v29, %v1132_v19  ;;  %v468_v39 = vpop.f32.mrb[3].mxu1 }
  0xeb   : > { %v610_v35 = vsel %vm546_vm3, %v474_v23, %v578_v31  ;;  %v922_v40 = vpack.c.bf16 %v594_v34, %v594_v34  ;;  %v592_v42 = vsel %vm528_vm4, %v402_v26, %v560_v32  ;;  %vm531_vm6 = vcmp.ge.f32.partialorder %v413_v36, 0.0 }
  0xec   : > { %v938_v41 = vpack.c.bf16 %v610_v35, %v610_v35  ;;  %v608_v43 = vsel %vm544_vm5, %v466_v27, %v576_v33  ;;  %v920_v44 = vpack.c.bf16 %v592_v42, %v592_v42  ;;  %v563_v46 = vmul.f32 0.01, %v413_v36 }
  0xed   : > { %v936_v45 = vpack.c.bf16 %v608_v43, %v608_v43  ;;  %755 = vst.msk [vmem:[%s1143_s29 + $0x8] sm:$0xf] %vm752_vm1, %v922_v40  ;;  %vm547_vm7 = vcmp.ge.f32.partialorder %v477_v37, 0.0  ;;  %v579_v47 = vmul.f32 0.01, %v477_v37  ;;  %v405_v48 = vadd.f32 %v1132_v19, %v404_v38  ;;  %v983_v50 = vpop.f32.mrb[4].mxu0 }
  0xee   : > { %771 = vst.msk [vmem:[%s1143_s29 + $0x48] sm:$0xf] %vm752_vm1, %v938_v41  ;;  %v469_v49 = vadd.f32 %v1132_v19, %v468_v39  ;;  %v999_v51 = vpop.f32.mrb[4].mxu1  ;;  %753 = vst.msk [vmem:[%s1143_s29] sm:$0xf] %vm752_vm1, %v920_v44  ;;  %v595_v52 = vsel %vm531_vm6, %v413_v36, %v563_v46  ;;  %v426_v53 = vadd.f32 %v983_v50, %v1132_v19  ;;  %v417_v55 = vpop.f32.mrb[5].mxu0 }
  0xef   : > { %769 = vst.msk [vmem:[%s1143_s29 + $0x40] sm:$0xf] %vm752_vm1, %v936_v45  ;;  %v490_v54 = vadd.f32 %v999_v51, %v1132_v19  ;;  %v481_v56 = vpop.f32.mrb[5].mxu1  ;;  %v923_v57 = vpack.c.bf16 %v595_v52, %v595_v52  ;;  %v611_v58 = vsel %vm547_vm7, %v477_v37, %v579_v47  ;;  %vm529_vm8 = vcmp.ge.f32.partialorder %v405_v48, 0.0  ;;  %v984_v60 = vpop.f32.mrb[6].mxu0 }
  0xf0   : > { %v561_v59 = vmul.f32 0.01, %v405_v48  ;;  %v1000_v61 = vpop.f32.mrb[6].mxu1  ;;  %v939_v62 = vpack.c.bf16 %v611_v58, %v611_v58  ;;  %vm545_vm9 = vcmp.ge.f32.partialorder %v469_v49, 0.0  ;;  %v577_v63 = vmul.f32 0.01, %v469_v49 }
  0xf1   : > { %vm534_vm10 = vcmp.ge.f32.partialorder %v426_v53, 0.0  ;;  %v420_v0 = vpop.f32.mrb[7].mxu0  ;;  %v484_v1 = vpop.f32.mrb[7].mxu1  ;;  %756 = vst.msk [vmem:[%s1143_s29 + $0xc] sm:$0xf] %vm752_vm1, %v923_v57  ;;  %vm550_vm11 = vcmp.ge.f32.partialorder %v490_v54, 0.0  ;;  %v418_v7 = vadd.f32 %v1132_v19, %v417_v55  ;;  %v482_v8 = vadd.f32 %v1132_v19, %v481_v56 }
  0xf2   : > { %v593_v2 = vsel %vm529_vm8, %v405_v48, %v561_v59  ;;  %v566_v3 = vmul.f32 0.01, %v426_v53  ;;  %v582_v4 = vmul.f32 0.01, %v490_v54  ;;  %772 = vst.msk [vmem:[%s1143_s29 + $0x4c] sm:$0xf] %vm752_vm1, %v939_v62  ;;  %v609_v6 = vsel %vm545_vm9, %v469_v49, %v577_v63 }
  0xf3   : > { %v921_v5 = vpack.c.bf16 %v593_v2, %v593_v2  ;;  %v937_v9 = vpack.c.bf16 %v609_v6, %v609_v6  ;;  %v429_v12 = vadd.f32 %v984_v60, %v1132_v19  ;;  %vm532_vm12 = vcmp.ge.f32.partialorder %v418_v7, 0.0 }
  0xf4   : > { %v598_v10 = vsel %vm534_vm10, %v426_v53, %v566_v3  ;;  %v614_v11 = vsel %vm550_vm11, %v490_v54, %v582_v4  ;;  %v564_v15 = vmul.f32 0.01, %v418_v7  ;;  %vm548_vm13 = vcmp.ge.f32.partialorder %v482_v8, 0.0 }
  0xf5   : > { %754 = vst.msk [vmem:[%s1143_s29 + $0x4] sm:$0xf] %vm752_vm1, %v921_v5  ;;  %v926_v13 = vpack.c.bf16 %v598_v10, %v598_v10  ;;  %v942_v14 = vpack.c.bf16 %v614_v11, %v614_v11  ;;  %770 = vst.msk [vmem:[%s1143_s29 + $0x44] sm:$0xf] %vm752_vm1, %v937_v9  ;;  %v580_v16 = vmul.f32 0.01, %v482_v8  ;;  %v493_v20 = vadd.f32 %v1000_v61, %v1132_v19 }
  0xf6   : > { %vm535_vm14 = vcmp.ge.f32.partialorder %v429_v12, 0.0  ;;  %v567_v17 = vmul.f32 0.01, %v429_v12  ;;  %v596_v18 = vsel %vm532_vm12, %v418_v7, %v564_v15  ;;  %v421_v21 = vadd.f32 %v1132_v19, %v420_v0  ;;  %v987_v23 = vpop.f32.mrb[8].mxu0  ;;  %v1003_v24 = vpop.f32.mrb[8].mxu1 }
  0xf7   : > { %759 = vst.msk [vmem:[%s1143_s29 + $0x18] sm:$0xf] %vm752_vm1, %v926_v13  ;;  %775 = vst.msk [vmem:[%s1143_s29 + $0x58] sm:$0xf] %vm752_vm1, %v942_v14  ;;  %v485_v22 = vadd.f32 %v1132_v19, %v484_v1  ;;  %v924_v25 = vpack.c.bf16 %v596_v18, %v596_v18  ;;  %v612_v26 = vsel %vm548_vm13, %v482_v8, %v580_v16  ;;  %v433_v29 = vpop.f32.mrb[9].mxu0  ;;  %v497_v30 = vpop.f32.mrb[9].mxu1 }
  0xf8   : > { %v599_v27 = vsel %vm535_vm14, %v429_v12, %v567_v17  ;;  %v442_v28 = vadd.f32 %v987_v23, %v1132_v19  ;;  %v940_v31 = vpack.c.bf16 %v612_v26, %v612_v26  ;;  %vm551_vm15 = vcmp.ge.f32.partialorder %v493_v20, 0.0  ;;  %v988_v34 = vpop.f32.mrb[10].mxu0  ;;  %v1004_v35 = vpop.f32.mrb[10].mxu1 }
  0xf9   : > { %v927_v32 = vpack.c.bf16 %v599_v27, %v599_v27  ;;  %v583_v33 = vmul.f32 0.01, %v493_v20  ;;  %757 = vst.msk [vmem:[%s1143_s29 + $0x10] sm:$0xf] %vm752_vm1, %v924_v25  ;;  %vm533_vm0 = vcmp.ge.f32.partialorder %v421_v21, 0.0  ;;  %vm549_vm2 = vcmp.ge.f32.partialorder %v485_v22, 0.0 }
  0xfa   : > { %v565_v36 = vmul.f32 0.01, %v421_v21  ;;  %v581_v37 = vmul.f32 0.01, %v485_v22  ;;  %773 = vst.msk [vmem:[%s1143_s29 + $0x50] sm:$0xf] %vm752_vm1, %v940_v31  ;;  %v506_v40 = vadd.f32 %v1003_v24, %v1132_v19  ;;  %v434_v46 = vadd.f32 %v1132_v19, %v433_v29 }
  0xfb   : > { %760 = vst.msk [vmem:[%s1143_s29 + $0x1c] sm:$0xf] %vm752_vm1, %v927_v32  ;;  %v615_v38 = vsel %vm551_vm15, %v493_v20, %v583_v33  ;;  %vm538_vm3 = vcmp.ge.f32.partialorder %v442_v28, 0.0  ;;  %v570_v39 = vmul.f32 0.01, %v442_v28  ;;  %v436_v41 = vpop.f32.mrb[11].mxu0  ;;  %v498_v54 = vadd.f32 %v1132_v19, %v497_v30 }
  0xfc   : > { %v500_v42 = vpop.f32.mrb[11].mxu1  ;;  %v943_v43 = vpack.c.bf16 %v615_v38, %v615_v38  ;;  %v597_v44 = vsel %vm533_vm0, %v421_v21, %v565_v36  ;;  %v613_v45 = vsel %vm549_vm2, %v485_v22, %v581_v37  ;;  %vm554_vm4 = vcmp.ge.f32.partialorder %v506_v40, 0.0 }
  0xfd   : > { %v925_v47 = vpack.c.bf16 %v597_v44, %v597_v44  ;;  %v941_v48 = vpack.c.bf16 %v613_v45, %v613_v45  ;;  %v602_v49 = vsel %vm538_vm3, %v442_v28, %v570_v39  ;;  %v586_v51 = vmul.f32 0.01, %v506_v40  ;;  %v991_v53 = vpop.f32.mrb[12].mxu0 }
  0xfe   : > { %776 = vst.msk [vmem:[%s1143_s29 + $0x5c] sm:$0xf] %vm752_vm1, %v943_v43  ;;  %v930_v50 = vpack.c.bf16 %v602_v49, %v602_v49  ;;  %vm536_vm5 = vcmp.ge.f32.partialorder %v434_v46, 0.0  ;;  %v568_v52 = vmul.f32 0.01, %v434_v46  ;;  %v445_v55 = vadd.f32 %v988_v34, %v1132_v19  ;;  %v1007_v58 = vpop.f32.mrb[12].mxu1 }
  0xff   : > { %758 = vst.msk [vmem:[%s1143_s29 + $0x14] sm:$0xf] %vm752_vm1, %v925_v47  ;;  %774 = vst.msk [vmem:[%s1143_s29 + $0x54] sm:$0xf] %vm752_vm1, %v941_v48  ;;  %v509_v56 = vadd.f32 %v1004_v35, %v1132_v19  ;;  %v437_v57 = vadd.f32 %v1132_v19, %v436_v41  ;;  %v449_v59 = vpop.f32.mrb[13].mxu0  ;;  %v618_v60 = vsel %vm554_vm4, %v506_v40, %v586_v51  ;;  %v513_v0 = vpop.f32.mrb[13].mxu1 }
 0x100   : > { %763 = vst.msk [vmem:[%s1143_s29 + $0x28] sm:$0xf] %vm752_vm1, %v930_v50  ;;  %v600_v61 = vsel %vm536_vm5, %v434_v46, %v568_v52  ;;  %v501_v62 = vadd.f32 %v1132_v19, %v500_v42  ;;  %v458_v63 = vadd.f32 %v991_v53, %v1132_v19  ;;  %v992_v1 = vpop.f32.mrb[14].mxu0  ;;  %v946_v2 = vpack.c.bf16 %v618_v60, %v618_v60  ;;  %v1008_v5 = vpop.f32.mrb[14].mxu1 }
 0x101   : > { %v928_v3 = vpack.c.bf16 %v600_v61, %v600_v61  ;;  %vm552_vm6 = vcmp.ge.f32.partialorder %v498_v54, 0.0  ;;  %v584_v4 = vmul.f32 0.01, %v498_v54  ;;  %v452_v6 = vpop.f32.mrb[15].mxu0  ;;  %vm539_vm7 = vcmp.ge.f32.partialorder %v445_v55, 0.0  ;;  %v516_v11 = vpop.f32.mrb[15].mxu1 }
 0x102   : > { %v571_v7 = vmul.f32 0.01, %v445_v55  ;;  %vm555_vm8 = vcmp.ge.f32.partialorder %v509_v56, 0.0  ;;  %v587_v8 = vmul.f32 0.01, %v509_v56  ;;  %vm537_vm9 = vcmp.ge.f32.partialorder %v437_v57, 0.0 }
 0x103   : > { %779 = vst.msk [vmem:[%s1143_s29 + $0x68] sm:$0xf] %vm752_vm1, %v946_v2  ;;  %761 = vst.msk [vmem:[%s1143_s29 + $0x20] sm:$0xf] %vm752_vm1, %v928_v3  ;;  %v616_v9 = vsel %vm552_vm6, %v498_v54, %v584_v4  ;;  %v569_v10 = vmul.f32 0.01, %v437_v57  ;;  %v522_v23 = vadd.f32 %v1007_v58, %v1132_v19  ;;  %v450_v25 = vadd.f32 %v1132_v19, %v449_v59 }
 0x104   : > { %vm553_vm10 = vcmp.ge.f32.partialorder %v501_v62, 0.0  ;;  %v944_v12 = vpack.c.bf16 %v616_v9, %v616_v9  ;;  %v603_v13 = vsel %vm539_vm7, %v445_v55, %v571_v7  ;;  %v619_v14 = vsel %vm555_vm8, %v509_v56, %v587_v8 }
 0x105   : > { %v585_v15 = vmul.f32 0.01, %v501_v62  ;;  %v931_v16 = vpack.c.bf16 %v603_v13, %v603_v13  ;;  %v947_v17 = vpack.c.bf16 %v619_v14, %v619_v14  ;;  %v601_v18 = vsel %vm537_vm9, %v437_v57, %v569_v10 }
 0x106   : > { %vm542_vm11 = vcmp.ge.f32.partialorder %v458_v63, 0.0  ;;  %777 = vst.msk [vmem:[%s1143_s29 + $0x60] sm:$0xf] %vm752_vm1, %v944_v12  ;;  %v929_v20 = vpack.c.bf16 %v601_v18, %v601_v18  ;;  %v574_v22 = vmul.f32 0.01, %v458_v63  ;;  %v514_v26 = vadd.f32 %v1132_v19, %v513_v0 }
 0x107   : > { %v617_v21 = vsel %vm553_vm10, %v501_v62, %v585_v15  ;;  %764 = vst.msk [vmem:[%s1143_s29 + $0x2c] sm:$0xf] %vm752_vm1, %v931_v16  ;;  %780 = vst.msk [vmem:[%s1143_s29 + $0x6c] sm:$0xf] %vm752_vm1, %v947_v17  ;;  %v461_v27 = vadd.f32 %v992_v1, %v1132_v19  ;;  %vm558_vm12 = vcmp.ge.f32.partialorder %v522_v23, 0.0  ;;  %v525_v30 = vadd.f32 %v1008_v5, %v1132_v19 }
 0x108   : > { %v945_v24 = vpack.c.bf16 %v617_v21, %v617_v21  ;;  %762 = vst.msk [vmem:[%s1143_s29 + $0x24] sm:$0xf] %vm752_vm1, %v929_v20  ;;  %v606_v28 = vsel %vm542_vm11, %v458_v63, %v574_v22  ;;  %v590_v29 = vmul.f32 0.01, %v522_v23  ;;  %vm540_vm13 = vcmp.ge.f32.partialorder %v450_v25, 0.0 }
 0x109   : > { %v934_v31 = vpack.c.bf16 %v606_v28, %v606_v28  ;;  %v572_v32 = vmul.f32 0.01, %v450_v25  ;;  %vm556_vm14 = vcmp.ge.f32.partialorder %v514_v26, 0.0  ;;  %v588_v34 = vmul.f32 0.01, %v514_v26 }
 0x10a   : > { %778 = vst.msk [vmem:[%s1143_s29 + $0x64] sm:$0xf] %vm752_vm1, %v945_v24  ;;  %v622_v33 = vsel %vm558_vm12, %v522_v23, %v590_v29  ;;  %vm543_vm15 = vcmp.ge.f32.partialorder %v461_v27, 0.0  ;;  %v575_v35 = vmul.f32 0.01, %v461_v27  ;;  %vm559_vm0 = vcmp.ge.f32.partialorder %v525_v30, 0.0 }
 0x10b   : > { %767 = vst.msk [vmem:[%s1143_s29 + $0x38] sm:$0xf] %vm752_vm1, %v934_v31  ;;  %v950_v36 = vpack.c.bf16 %v622_v33, %v622_v33  ;;  %v604_v37 = vsel %vm540_vm13, %v450_v25, %v572_v32  ;;  %v591_v38 = vmul.f32 0.01, %v525_v30  ;;  %v620_v40 = vsel %vm556_vm14, %v514_v26, %v588_v34 }
 0x10c   : > { %v932_v39 = vpack.c.bf16 %v604_v37, %v604_v37  ;;  %v607_v41 = vsel %vm543_vm15, %v461_v27, %v575_v35  ;;  %v453_v42 = vadd.f32 %v1132_v19, %v452_v6  ;;  %v948_v43 = vpack.c.bf16 %v620_v40, %v620_v40 }
 0x10d   : > { %783 = vst.msk [vmem:[%s1143_s29 + $0x78] sm:$0xf] %vm752_vm1, %v950_v36  ;;  %v935_v44 = vpack.c.bf16 %v607_v41, %v607_v41  ;;  %v623_v45 = vsel %vm559_vm0, %v525_v30, %v591_v38  ;;  %v517_v46 = vadd.f32 %v1132_v19, %v516_v11 }
 0x10e   : > { %765 = vst.msk [vmem:[%s1143_s29 + $0x30] sm:$0xf] %vm752_vm1, %v932_v39  ;;  %v951_v47 = vpack.c.bf16 %v623_v45, %v623_v45  ;;  %vm541_vm2 = vcmp.ge.f32.partialorder %v453_v42, 0.0  ;;  %v573_v48 = vmul.f32 0.01, %v453_v42 }
 0x10f   : > { %781 = vst.msk [vmem:[%s1143_s29 + $0x70] sm:$0xf] %vm752_vm1, %v948_v43  ;;  %768 = vst.msk [vmem:[%s1143_s29 + $0x3c] sm:$0xf] %vm752_vm1, %v935_v44  ;;  %vm557_vm3 = vcmp.ge.f32.partialorder %v517_v46, 0.0 }
 0x110   : > { %v589_v49 = vmul.f32 0.01, %v517_v46  ;;  %784 = vst.msk [vmem:[%s1143_s29 + $0x7c] sm:$0xf] %vm752_vm1, %v951_v47  ;;  %v605_v50 = vsel %vm541_vm2, %v453_v42, %v573_v48 }
 0x111   : > { %v933_v51 = vpack.c.bf16 %v605_v50, %v605_v50 }
 0x112   : > { %v621_v52 = vsel %vm557_vm3, %v517_v46, %v589_v49 }
 0x113   : > { %v949_v53 = vpack.c.bf16 %v621_v52, %v621_v52  ;;  %766 = vst.msk [vmem:[%s1143_s29 + $0x34] sm:$0xf] %vm752_vm1, %v933_v51 }
 0x115   : > { %782 = vst.msk [vmem:[%s1143_s29 + $0x74] sm:$0xf] %vm752_vm1, %v949_v53 }
 0x116 PF: > { %s13_s12 = sadd.s32 1, %s1048_s12  }
 0x117   : > { %p10_p4 = scmp.ge.s32.totalorder %s13_s12, 4  }
 0x119   :  { %12 = sbr.rel (!%p10_p4) target bundleno = 1 (0x1), region = 62 }

// kernel: _patchdis_forward_impl.6
= control target key start
LH: loop header
LB: loop body
LE: loop exit
PB: predicated region body
PF: predicated region fallthrough
CT: control target
= control target key end

     0   :  { %vm359_vm0 = vcmask 125952   ;;  %s662_s1 = inlined_call_operand.vmem [shape: bf16[128,16], index: 1, kind: input, shape index: {}]   ;;  %s663_s0 = inlined_call_operand.vmem [shape: bf16[128,128], index: 0, kind: input, shape index: {}]   ;;  %s664_s2 = inlined_call_operand.vmem [shape: f32[1,16], index: 2, kind: input, shape index: {}]   ;;  %s665_s3 = inlined_call_operand.vmem [shape: bf16[128,16], index: 3, kind: output, shape index: {}]  }
   0x1   :  { %v493_v0 = vld [vmem:[%s662_s1] sm:$0xff]   ;;  %v494_v1 = vld [vmem:[%s662_s1 + $0x8] sm:$0xff]   ;;  %v495_v2 = vld [vmem:[%s662_s1 + $0x10] sm:$0xff]  }
   0x2   :  { %445 = vmatprep.subr.bf16.mxu0 %v493_v0  ;;  %477 = vmatprep.subr.bf16.mxu1 %v493_v0  ;;  %v496_v3 = vld [vmem:[%s662_s1 + $0x18] sm:$0xff]   ;;  %v501_v4 = vld [vmem:[%s663_s0] sm:$0xff]   ;;  %v498_v7 = vld [vmem:[%s662_s1 + $0x28] sm:$0xff]  }
   0x3   :  { %446 = vmatpush3.bf16.msra.mxu0 %v493_v0  ;;  %485 = vmatpush3.bf16.msra.mxu1 %v493_v0  ;;  %v502_v5 = vld [vmem:[%s663_s0 + $0x20] sm:$0xff]   ;;  %v499_v8 = vld [vmem:[%s662_s1 + $0x30] sm:$0xff]   ;;  %v500_v9 = vld [vmem:[%s662_s1 + $0x38] sm:$0xff]  }
   0x4   :  { %447 = vmatprep.subr.bf16.mxu0 %v494_v1  ;;  %478 = vmatprep.subr.bf16.mxu1 %v494_v1  ;;  %v497_v6 = vld [vmem:[%s662_s1 + $0x20] sm:$0xff]   ;;  %v503_v10 = vld [vmem:[%s663_s0 + $0x8] sm:$0xff]   ;;  %v505_v12 = vld [vmem:[%s663_s0 + $0x10] sm:$0xff]  }
   0x5   :  { %461 = vmatprep.mubr.bf16.mxu0 %v501_v4  ;;  %469 = vmatprep.mubr.bf16.mxu1 %v502_v5  ;;  %v504_v11 = vld [vmem:[%s663_s0 + $0x28] sm:$0xff]   ;;  %v506_v13 = vld [vmem:[%s663_s0 + $0x30] sm:$0xff]   ;;  %v507_v14 = vld [vmem:[%s663_s0 + $0x18] sm:$0xff]  }
   0x6   :  { %v508_v15 = vld [vmem:[%s663_s0 + $0x38] sm:$0xff]   ;;  %v580_v16 = vld [vmem:[%s664_s2] ss:$0 sm:$0xff] }
   0x7   :  { %448 = vmatpush3.bf16.msra.mxu0 %v494_v1  ;;  %486 = vmatpush3.bf16.msra.mxu1 %v494_v1 }
   0x8   :  { %449 = vmatprep.subr.bf16.mxu0 %v495_v2  ;;  %479 = vmatprep.subr.bf16.mxu1 %v495_v2 }
   0xb   :  { %450 = vmatpush3.bf16.msra.mxu0 %v495_v2  ;;  %487 = vmatpush3.bf16.msra.mxu1 %v495_v2 }
   0xc   :  { %451 = vmatprep.subr.bf16.mxu0 %v496_v3  ;;  %480 = vmatprep.subr.bf16.mxu1 %v496_v3 }
   0xf   :  { %452 = vmatpush3.bf16.msra.mxu0 %v496_v3  ;;  %488 = vmatpush3.bf16.msra.mxu1 %v496_v3 }
  0x10   :  { %453 = vmatprep.subr.bf16.mxu0 %v497_v6  ;;  %481 = vmatprep.subr.bf16.mxu1 %v497_v6 }
  0x13   :  { %454 = vmatpush3.bf16.msra.mxu0 %v497_v6  ;;  %489 = vmatpush3.bf16.msra.mxu1 %v497_v6 }
  0x14   :  { %455 = vmatprep.subr.bf16.mxu0 %v498_v7  ;;  %482 = vmatprep.subr.bf16.mxu1 %v498_v7 }
  0x17   :  { %456 = vmatpush3.bf16.msra.mxu0 %v498_v7  ;;  %490 = vmatpush3.bf16.msra.mxu1 %v498_v7 }
  0x18   :  { %457 = vmatprep.subr.bf16.mxu0 %v499_v8  ;;  %483 = vmatprep.subr.bf16.mxu1 %v499_v8 }
  0x1b   :  { %458 = vmatpush3.bf16.msra.mxu0 %v499_v8  ;;  %491 = vmatpush3.bf16.msra.mxu1 %v499_v8 }
  0x1c   :  { %459 = vmatprep.subr.bf16.mxu0 %v500_v9  ;;  %484 = vmatprep.subr.bf16.mxu1 %v500_v9 }
  0x1f   :  { %460 = vmatpush3.bf16.msra.mxu0 %v500_v9  ;;  %492 = vmatpush3.bf16.msra.mxu1 %v500_v9 }
  0x22   :  { %462 = vmatmul.mubr.bf16.vlgmr.msra.gmra.mrb[0].mxu0 %v503_v10  ;;  %470 = vmatmul.mubr.bf16.vlgmr.msra.gmra.mrb[0].mxu1 %v504_v11 }
  0x23   :  { %465 = vmatprep.mubr.bf16.mxu0 %v505_v12  ;;  %473 = vmatprep.mubr.bf16.mxu1 %v506_v13 }
  0x2a   :  { %466 = vmatmul.mubr.bf16.gmra.mrb[4].mxu0 %v507_v14  ;;  %474 = vmatmul.mubr.bf16.gmra.mrb[4].mxu1 %v508_v15 }
  0xf5   :  { %v463_v17 = vpop.f32.mrb[0].mxu0  ;;  %v471_v18 = vpop.f32.mrb[0].mxu1 }
  0xf6   :  { %v193_v19 = vadd.f32 %v463_v17, %v580_v16  ;;  %v225_v20 = vadd.f32 %v471_v18, %v580_v16  ;;  %v184_v21 = vpop.f32.mrb[1].mxu0  ;;  %v216_v22 = vpop.f32.mrb[1].mxu1 }
  0xf7   :  { %v185_v23 = vadd.f32 %v580_v16, %v184_v21  ;;  %v217_v24 = vadd.f32 %v580_v16, %v216_v22  ;;  %v464_v25 = vpop.f32.mrb[2].mxu0  ;;  %v472_v26 = vpop.f32.mrb[2].mxu1 }
  0xf8   :  { %vm249_vm1 = vcmp.ge.f32.partialorder %v193_v19, 0.0  ;;  %v265_v27 = vmul.f32 0.01, %v193_v19  ;;  %vm257_vm2 = vcmp.ge.f32.partialorder %v225_v20, 0.0  ;;  %v273_v28 = vmul.f32 0.01, %v225_v20 }
  0xf9   :  { %vm247_vm3 = vcmp.ge.f32.partialorder %v185_v23, 0.0  ;;  %v263_v29 = vmul.f32 0.01, %v185_v23  ;;  %vm255_vm4 = vcmp.ge.f32.partialorder %v217_v24, 0.0  ;;  %v271_v30 = vmul.f32 0.01, %v217_v24 }
  0xfa   :  { %v281_v31 = vsel %vm249_vm1, %v193_v19, %v265_v27  ;;  %v289_v32 = vsel %vm257_vm2, %v225_v20, %v273_v28  ;;  %v196_v33 = vadd.f32 %v464_v25, %v580_v16  ;;  %v228_v34 = vadd.f32 %v472_v26, %v580_v16  ;;  %v187_v35 = vpop.f32.mrb[3].mxu0  ;;  %v219_v36 = vpop.f32.mrb[3].mxu1 }
  0xfb   :  { %v415_v37 = vpack.c.bf16 %v281_v31, %v281_v31  ;;  %v423_v38 = vpack.c.bf16 %v289_v32, %v289_v32  ;;  %v279_v39 = vsel %vm247_vm3, %v185_v23, %v263_v29  ;;  %v287_v40 = vsel %vm255_vm4, %v217_v24, %v271_v30 }
  0xfc   :  { %v413_v41 = vpack.c.bf16 %v279_v39, %v279_v39  ;;  %v421_v42 = vpack.c.bf16 %v287_v40, %v287_v40  ;;  %vm250_vm5 = vcmp.ge.f32.partialorder %v196_v33, 0.0  ;;  %v266_v43 = vmul.f32 0.01, %v196_v33 }
  0xfd   :  { %362 = vst.msk [vmem:[%s665_s3 + $0x8] sm:$0xf] %vm359_vm0, %v415_v37  ;;  %370 = vst.msk [vmem:[%s665_s3 + $0x28] sm:$0xf] %vm359_vm0, %v423_v38  ;;  %vm258_vm6 = vcmp.ge.f32.partialorder %v228_v34, 0.0  ;;  %v188_v45 = vadd.f32 %v580_v16, %v187_v35  ;;  %v220_v46 = vadd.f32 %v580_v16, %v219_v36  ;;  %v467_v47 = vpop.f32.mrb[4].mxu0 }
  0xfe   :  { %v274_v44 = vmul.f32 0.01, %v228_v34  ;;  %v475_v48 = vpop.f32.mrb[4].mxu1  ;;  %360 = vst.msk [vmem:[%s665_s3] sm:$0xf] %vm359_vm0, %v413_v41  ;;  %v282_v49 = vsel %vm250_vm5, %v196_v33, %v266_v43  ;;  %v209_v50 = vadd.f32 %v467_v47, %v580_v16  ;;  %v200_v52 = vpop.f32.mrb[5].mxu0 }
  0xff   :  { %368 = vst.msk [vmem:[%s665_s3 + $0x20] sm:$0xf] %vm359_vm0, %v421_v42  ;;  %v241_v51 = vadd.f32 %v475_v48, %v580_v16  ;;  %v232_v53 = vpop.f32.mrb[5].mxu1  ;;  %v416_v54 = vpack.c.bf16 %v282_v49, %v282_v49  ;;  %vm248_vm7 = vcmp.ge.f32.partialorder %v188_v45, 0.0  ;;  %v264_v56 = vmul.f32 0.01, %v188_v45 }
 0x100   :  { %v290_v55 = vsel %vm258_vm6, %v228_v34, %v274_v44  ;;  %v468_v57 = vpop.f32.mrb[6].mxu0  ;;  %v476_v58 = vpop.f32.mrb[6].mxu1  ;;  %vm256_vm8 = vcmp.ge.f32.partialorder %v220_v46, 0.0  ;;  %v272_v60 = vmul.f32 0.01, %v220_v46  ;;  %vm253_vm9 = vcmp.ge.f32.partialorder %v209_v50, 0.0 }
 0x101   :  { %v424_v59 = vpack.c.bf16 %v290_v55, %v290_v55  ;;  %v203_v61 = vpop.f32.mrb[7].mxu0  ;;  %v235_v62 = vpop.f32.mrb[7].mxu1  ;;  %363 = vst.msk [vmem:[%s665_s3 + $0xc] sm:$0xf] %vm359_vm0, %v416_v54  ;;  %v280_v63 = vsel %vm248_vm7, %v188_v45, %v264_v56  ;;  %v269_v0 = vmul.f32 0.01, %v209_v50  ;;  %v201_v4 = vadd.f32 %v580_v16, %v200_v52 }
 0x102   :  { %vm261_vm10 = vcmp.ge.f32.partialorder %v241_v51, 0.0  ;;  %v277_v1 = vmul.f32 0.01, %v241_v51  ;;  %v414_v2 = vpack.c.bf16 %v280_v63, %v280_v63  ;;  %v288_v3 = vsel %vm256_vm8, %v220_v46, %v272_v60 }
 0x103   :  { %371 = vst.msk [vmem:[%s665_s3 + $0x2c] sm:$0xf] %vm359_vm0, %v424_v59  ;;  %v233_v5 = vadd.f32 %v580_v16, %v232_v53  ;;  %v422_v6 = vpack.c.bf16 %v288_v3, %v288_v3  ;;  %v285_v7 = vsel %vm253_vm9, %v209_v50, %v269_v0  ;;  %v212_v9 = vadd.f32 %v468_v57, %v580_v16 }
 0x104   :  { %v293_v8 = vsel %vm261_vm10, %v241_v51, %v277_v1  ;;  %361 = vst.msk [vmem:[%s665_s3 + $0x4] sm:$0xf] %vm359_vm0, %v414_v2  ;;  %v419_v10 = vpack.c.bf16 %v285_v7, %v285_v7  ;;  %vm251_vm11 = vcmp.ge.f32.partialorder %v201_v4, 0.0  ;;  %v267_v12 = vmul.f32 0.01, %v201_v4 }
 0x105   :  { %v427_v11 = vpack.c.bf16 %v293_v8, %v293_v8  ;;  %369 = vst.msk [vmem:[%s665_s3 + $0x24] sm:$0xf] %vm359_vm0, %v422_v6  ;;  %vm259_vm12 = vcmp.ge.f32.partialorder %v233_v5, 0.0  ;;  %v275_v13 = vmul.f32 0.01, %v233_v5  ;;  %vm254_vm13 = vcmp.ge.f32.partialorder %v212_v9, 0.0 }
 0x106   :  { %v270_v14 = vmul.f32 0.01, %v212_v9  ;;  %366 = vst.msk [vmem:[%s665_s3 + $0x18] sm:$0xf] %vm359_vm0, %v419_v10  ;;  %v283_v15 = vsel %vm251_vm11, %v201_v4, %v267_v12  ;;  %v244_v17 = vadd.f32 %v476_v58, %v580_v16  ;;  %v204_v18 = vadd.f32 %v580_v16, %v203_v61 }
 0x107   :  { %374 = vst.msk [vmem:[%s665_s3 + $0x38] sm:$0xf] %vm359_vm0, %v427_v11  ;;  %v236_v19 = vadd.f32 %v580_v16, %v235_v62  ;;  %v417_v20 = vpack.c.bf16 %v283_v15, %v283_v15  ;;  %v291_v21 = vsel %vm259_vm12, %v233_v5, %v275_v13 }
 0x108   :  { %v286_v22 = vsel %vm254_vm13, %v212_v9, %v270_v14  ;;  %v425_v23 = vpack.c.bf16 %v291_v21, %v291_v21  ;;  %vm262_vm14 = vcmp.ge.f32.partialorder %v244_v17, 0.0  ;;  %v278_v25 = vmul.f32 0.01, %v244_v17 }
 0x109   :  { %v420_v24 = vpack.c.bf16 %v286_v22, %v286_v22  ;;  %364 = vst.msk [vmem:[%s665_s3 + $0x10] sm:$0xf] %vm359_vm0, %v417_v20  ;;  %vm252_vm15 = vcmp.ge.f32.partialorder %v204_v18, 0.0  ;;  %v268_v26 = vmul.f32 0.01, %v204_v18  ;;  %vm260_vm1 = vcmp.ge.f32.partialorder %v236_v19, 0.0 }
 0x10a   :  { %v276_v27 = vmul.f32 0.01, %v236_v19  ;;  %372 = vst.msk [vmem:[%s665_s3 + $0x30] sm:$0xf] %vm359_vm0, %v425_v23  ;;  %v294_v16 = vsel %vm262_vm14, %v244_v17, %v278_v25 }
 0x10b   :  { %367 = vst.msk [vmem:[%s665_s3 + $0x1c] sm:$0xf] %vm359_vm0, %v420_v24  ;;  %v428_v28 = vpack.c.bf16 %v294_v16, %v294_v16  ;;  %v284_v29 = vsel %vm252_vm15, %v204_v18, %v268_v26 }
 0x10c   :  { %v292_v30 = vsel %vm260_vm1, %v236_v19, %v276_v27  ;;  %v418_v31 = vpack.c.bf16 %v284_v29, %v284_v29 }
 0x10d   :  { %v426_v32 = vpack.c.bf16 %v292_v30, %v292_v30  ;;  %375 = vst.msk [vmem:[%s665_s3 + $0x3c] sm:$0xf] %vm359_vm0, %v428_v28 }
 0x10e   :  { %365 = vst.msk [vmem:[%s665_s3 + $0x14] sm:$0xf] %vm359_vm0, %v418_v31 }
 0x10f   :  { %373 = vst.msk [vmem:[%s665_s3 + $0x34] sm:$0xf] %vm359_vm0, %v426_v32 }

// kernel: _patchdis_forward_impl.7
= control target key start
LH: loop header
LB: loop body
LE: loop exit
PB: predicated region body
PF: predicated region fallthrough
CT: control target
= control target key end

     0   :  { %vm251_vm2 = vcmask 257024   ;;  %s450_s1 = inlined_call_operand.vmem [shape: bf16[256,32], index: 1, kind: input, shape index: {}]   ;;  %s451_s0 = inlined_call_operand.vmem [shape: bf16[32,256], index: 0, kind: input, shape index: {}]   ;;  %s452_s2 = inlined_call_operand.vmem [shape: f32[1,32], index: 2, kind: input, shape index: {}]   ;;  %s453_s3 = inlined_call_operand.vmem [shape: bf16[32,32], index: 3, kind: output, shape index: {}]  }
   0x1   :  { %v333_v0 = vld [vmem:[%s450_s1 + $0x40] sm:$0xff]   ;;  %v335_v2 = vld [vmem:[%s450_s1 + $0x48] sm:$0xff]   ;;  %v337_v4 = vld [vmem:[%s450_s1 + $0x50] sm:$0xff]  }
   0x2   :  { %v334_v1 = vld [vmem:[%s450_s1] sm:$0xff]   ;;  %289 = vmatprep.subr.bf16.mxu0 %v333_v0  ;;  %317 = vmatprep.subr.bf16.mxu1 %v333_v0  ;;  %v336_v3 = vld [vmem:[%s450_s1 + $0x8] sm:$0xff]   ;;  %v338_v5 = vld [vmem:[%s450_s1 + $0x10] sm:$0xff]  }
   0x3   :  { %290 = vmatpush3.bf16.msra.mxu0 %v334_v1  ;;  %325 = vmatpush3.bf16.msra.mxu1 %v334_v1  ;;  %v339_v6 = vld [vmem:[%s450_s1 + $0x58] sm:$0xff]   ;;  %v341_v8 = vld [vmem:[%s450_s1 + $0x60] sm:$0xff]   ;;  %v343_v10 = vld [vmem:[%s450_s1 + $0x68] sm:$0xff]  }
   0x4   :  { %291 = vmatprep.subr.bf16.mxu0 %v335_v2  ;;  %318 = vmatprep.subr.bf16.mxu1 %v335_v2  ;;  %v340_v7 = vld [vmem:[%s450_s1 + $0x18] sm:$0xff]   ;;  %v342_v9 = vld [vmem:[%s450_s1 + $0x20] sm:$0xff]   ;;  %v344_v13 = vld [vmem:[%s450_s1 + $0x28] sm:$0xff]  }
   0x5   :  { %v351_v11 = vld [vmem:[%s451_s0 + $0x4] ss:$8 sps:$4 sm:$0xff]   ;;  %v354_v12 = vld [vmem:[%s451_s0 + $0x14] ss:$8 sps:$4 sm:$0xff]   ;;  %v349_v18 = vld [vmem:[%s451_s0] ss:$8 sps:$4 sm:$0xff]  }
   0x6   :  { %v345_v14 = vld [vmem:[%s450_s1 + $0x70] sm:$0xff]   ;;  %206 = vmatprep.mubr.bf16.mxu0 %v351_v11  ;;  %214 = vmatprep.mubr.bf16.mxu1 %v354_v12  ;;  %v347_v16 = vld [vmem:[%s450_s1 + $0x78] sm:$0xff]   ;;  %v260_v22 = vld [vmem:[%s452_s2] ss:$0 sm:$0xff] }
   0x7   :  { %292 = vmatpush3.bf16.msra.mxu0 %v336_v3  ;;  %326 = vmatpush3.bf16.msra.mxu1 %v336_v3  ;;  %v346_v15 = vld [vmem:[%s450_s1 + $0x30] sm:$0xff]   ;;  %v348_v17 = vld [vmem:[%s450_s1 + $0x38] sm:$0xff]  }
   0x8   :  { %293 = vmatprep.subr.bf16.mxu0 %v337_v4  ;;  %319 = vmatprep.subr.bf16.mxu1 %v337_v4  ;;  %v352_v19 = vld [vmem:[%s451_s0 + $0x10] ss:$8 sps:$4 sm:$0xff]  }
   0xb   :  { %294 = vmatpush3.bf16.msra.mxu0 %v338_v5  ;;  %327 = vmatpush3.bf16.msra.mxu1 %v338_v5 }
   0xc   :  { %295 = vmatprep.subr.bf16.mxu0 %v339_v6  ;;  %320 = vmatprep.subr.bf16.mxu1 %v339_v6 }
   0xf   :  { %296 = vmatpush3.bf16.msra.mxu0 %v340_v7  ;;  %328 = vmatpush3.bf16.msra.mxu1 %v340_v7 }
  0x10   :  { %297 = vmatprep.subr.bf16.mxu0 %v341_v8  ;;  %321 = vmatprep.subr.bf16.mxu1 %v341_v8 }
  0x13   :  { %298 = vmatpush3.bf16.msra.mxu0 %v342_v9  ;;  %329 = vmatpush3.bf16.msra.mxu1 %v342_v9 }
  0x14   :  { %299 = vmatprep.subr.bf16.mxu0 %v343_v10  ;;  %322 = vmatprep.subr.bf16.mxu1 %v343_v10 }
  0x17   :  { %300 = vmatpush3.bf16.msra.mxu0 %v344_v13  ;;  %330 = vmatpush3.bf16.msra.mxu1 %v344_v13 }
  0x18   :  { %301 = vmatprep.subr.bf16.mxu0 %v345_v14  ;;  %323 = vmatprep.subr.bf16.mxu1 %v345_v14 }
  0x1b   :  { %302 = vmatpush3.bf16.msra.mxu0 %v346_v15  ;;  %331 = vmatpush3.bf16.msra.mxu1 %v346_v15 }
  0x1c   :  { %303 = vmatprep.subr.bf16.mxu0 %v347_v16  ;;  %324 = vmatprep.subr.bf16.mxu1 %v347_v16 }
  0x1f   :  { %304 = vmatpush3.bf16.msra.mxu0 %v348_v17  ;;  %332 = vmatpush3.bf16.msra.mxu1 %v348_v17 }
  0x22   :  { %207 = vmatmul.mubr.bf16.vlgmr.msra.gmra.mrb[0].mxu0 %v349_v18  ;;  %215 = vmatmul.mubr.bf16.vlgmr.msra.gmra.mrb[0].mxu1 %v352_v19 }
  0xf5   :  { %v305_v20 = vpop.f32.mrb[0].mxu0  ;;  %v311_v21 = vpop.f32.mrb[0].mxu1 }
  0xf6   :  { %v306_v23 = vpop.f32.mrb[1].mxu0  ;;  %v312_v24 = vpop.f32.mrb[1].mxu1 }
  0xf7   :  { %v307_v25 = vadd.f32 %v306_v23, %v305_v20  ;;  %v313_v26 = vadd.f32 %v312_v24, %v311_v21  ;;  %v308_v27 = vpop.f32.mrb[2].mxu0  ;;  %v314_v28 = vpop.f32.mrb[2].mxu1 }
  0xf8   :  { %v309_v29 = vpop.f32.mrb[3].mxu0  ;;  %v315_v30 = vpop.f32.mrb[3].mxu1 }
  0xf9   :  { %v209_v31 = vadd.f32 %v307_v25, %v260_v22  ;;  %v217_v32 = vadd.f32 %v313_v26, %v260_v22  ;;  %v310_v33 = vadd.f32 %v309_v29, %v308_v27  ;;  %v316_v34 = vadd.f32 %v315_v30, %v314_v28 }
  0xfb   :  { %vm223_vm0 = vcmp.ge.f32.partialorder %v209_v31, 0.0  ;;  %v227_v35 = vmul.f32 0.01, %v209_v31  ;;  %vm225_vm1 = vcmp.ge.f32.partialorder %v217_v32, 0.0  ;;  %v229_v36 = vmul.f32 0.01, %v217_v32 }
  0xfc   :  { %v212_v37 = vadd.f32 %v310_v33, %v260_v22  ;;  %v220_v38 = vadd.f32 %v316_v34, %v260_v22 }
  0xfd   :  { %v231_v39 = vsel %vm223_vm0, %v209_v31, %v227_v35  ;;  %v233_v40 = vsel %vm225_vm1, %v217_v32, %v229_v36 }
  0xfe   :  { %v285_v41 = vpack.c.bf16 %v231_v39, %v231_v39  ;;  %v287_v42 = vpack.c.bf16 %v233_v40, %v233_v40  ;;  %vm224_vm3 = vcmp.ge.f32.partialorder %v212_v37, 0.0  ;;  %v228_v43 = vmul.f32 0.01, %v212_v37 }
  0xff   :  { %vm226_vm4 = vcmp.ge.f32.partialorder %v220_v38, 0.0  ;;  %v230_v44 = vmul.f32 0.01, %v220_v38 }
 0x100   :  { %252 = vst.msk [vmem:[%s453_s3] sm:$0xf] %vm251_vm2, %v285_v41  ;;  %254 = vst.msk [vmem:[%s453_s3 + $0x8] sm:$0xf] %vm251_vm2, %v287_v42  ;;  %v232_v45 = vsel %vm224_vm3, %v212_v37, %v228_v43 }
 0x101   :  { %v286_v46 = vpack.c.bf16 %v232_v45, %v232_v45  ;;  %v234_v47 = vsel %vm226_vm4, %v220_v38, %v230_v44 }
 0x102   :  { %v288_v48 = vpack.c.bf16 %v234_v47, %v234_v47 }
 0x103   :  { %253 = vst.msk [vmem:[%s453_s3 + $0x4] sm:$0xf] %vm251_vm2, %v286_v46 }
 0x104   :  { %255 = vst.msk [vmem:[%s453_s3 + $0xc] sm:$0xf] %vm251_vm2, %v288_v48 }

// kernel: _patchdis_forward_impl.8
= control target key start
LH: loop header
LB: loop body
LE: loop exit
PB: predicated region body
PF: predicated region fallthrough
CT: control target
= control target key end

     0   :  { %vm436_vm1 = vcmask 519168   ;;  %s738_s1 = inlined_call_operand.vmem [shape: bf16[512,64], index: 1, kind: input, shape index: {}]   ;;  %s739_s0 = inlined_call_operand.vmem [shape: bf16[24,512], index: 0, kind: input, shape index: {}]   ;;  %s740_s2 = inlined_call_operand.vmem [shape: f32[1,64], index: 2, kind: input, shape index: {}]   ;;  %s741_s3 = inlined_call_operand.vmem [shape: bf16[24,64], index: 3, kind: output, shape index: {}]  }
   0x1   :  { %v547_v0 = vld [vmem:[%s738_s1 + $0x40] sm:$0xff]   ;;  %v551_v4 = vld [vmem:[%s738_s1 + $0x48] sm:$0xff]   ;;  %v555_v8 = vld [vmem:[%s738_s1 + $0x50] sm:$0xff]  }
   0x2   :  { %v548_v1 = vld [vmem:[%s738_s1 + $0xc0] sm:$0xff]   ;;  %491 = vmatprep.subr.bf16.mxu0 %v547_v0  ;;  %v552_v5 = vld [vmem:[%s738_s1 + $0xc8] sm:$0xff]   ;;  %v556_v9 = vld [vmem:[%s738_s1 + $0xd0] sm:$0xff]  }
   0x3   :  { %v549_v2 = vld [vmem:[%s738_s1] sm:$0xff]   ;;  %519 = vmatprep.subr.bf16.mxu1 %v548_v1  ;;  %v553_v6 = vld [vmem:[%s738_s1 + $0x8] sm:$0xff]   ;;  %v557_v10 = vld [vmem:[%s738_s1 + $0x10] sm:$0xff]  }
   0x4   :  { %v550_v3 = vld [vmem:[%s738_s1 + $0x80] sm:$0xff]   ;;  %492 = vmatpush3.bf16.msra.mxu0 %v549_v2  ;;  %v554_v7 = vld [vmem:[%s738_s1 + $0x88] sm:$0xff]   ;;  %v558_v11 = vld [vmem:[%s738_s1 + $0x90] sm:$0xff]  }
   0x5   :  { %520 = vmatpush3.bf16.msra.mxu1 %v550_v3  ;;  %493 = vmatprep.subr.bf16.mxu0 %v551_v4  ;;  %v559_v12 = vld [vmem:[%s738_s1 + $0x58] sm:$0xff]   ;;  %v563_v16 = vld [vmem:[%s738_s1 + $0x60] sm:$0xff]   ;;  %v567_v20 = vld [vmem:[%s738_s1 + $0x68] sm:$0xff]  }
   0x6   :  { %521 = vmatprep.subr.bf16.mxu1 %v552_v5  ;;  %v560_v13 = vld [vmem:[%s738_s1 + $0xd8] sm:$0xff]   ;;  %v564_v17 = vld [vmem:[%s738_s1 + $0xe0] sm:$0xff]   ;;  %v568_v21 = vld [vmem:[%s738_s1 + $0xe8] sm:$0xff]  }
   0x7   :  { %v561_v14 = vld [vmem:[%s738_s1 + $0x18] sm:$0xff]   ;;  %v565_v18 = vld [vmem:[%s738_s1 + $0x20] sm:$0xff]   ;;  %v569_v22 = vld [vmem:[%s738_s1 + $0x28] sm:$0xff]  }
   0x8   :  { %494 = vmatpush3.bf16.msra.mxu0 %v553_v6  ;;  %v562_v15 = vld [vmem:[%s738_s1 + $0x98] sm:$0xff]   ;;  %v566_v19 = vld [vmem:[%s738_s1 + $0xa0] sm:$0xff]   ;;  %v570_v23 = vld [vmem:[%s738_s1 + $0xa8] sm:$0xff]  }
   0x9   :  { %522 = vmatpush3.bf16.msra.mxu1 %v554_v7  ;;  %495 = vmatprep.subr.bf16.mxu0 %v555_v8  ;;  %v571_v24 = vld [vmem:[%s738_s1 + $0x70] sm:$0xff]   ;;  %v575_v28 = vld [vmem:[%s738_s1 + $0x78] sm:$0xff]   ;;  %v19_v36 = vld [vmem:[%s739_s0 + $0x20] sm:$0xff] }
   0xa   :  { %523 = vmatprep.subr.bf16.mxu1 %v556_v9  ;;  %v572_v25 = vld [vmem:[%s738_s1 + $0xf0] sm:$0xff]   ;;  %v576_v29 = vld [vmem:[%s738_s1 + $0xf8] sm:$0xff]   ;;  %v450_v37 = vcombine.high %v19_v36, %v19_v36  ;;  %v20_v38 = vld [vmem:[%s739_s0 + $0x28] sm:$0xff]  ;;  %v449_v40 = vcombine.low %v19_v36, %v19_v36 }
   0xb   :  { %v573_v26 = vld [vmem:[%s738_s1 + $0x30] sm:$0xff]   ;;  %v577_v30 = vld [vmem:[%s738_s1 + $0x38] sm:$0xff]   ;;  %v452_v39 = vcombine.high %v20_v38, %v20_v38  ;;  %v451_v41 = vcombine.low %v20_v38, %v20_v38  ;;  %v444_v44 = vld [vmem:[%s740_s2] ss:$0 sm:$0xff] }
   0xc   :  { %496 = vmatpush3.bf16.msra.mxu0 %v557_v10  ;;  %v574_v27 = vld [vmem:[%s738_s1 + $0xb0] sm:$0xff]   ;;  %v578_v31 = vld [vmem:[%s738_s1 + $0xb8] sm:$0xff]  }
   0xd   :  { %524 = vmatpush3.bf16.msra.mxu1 %v558_v11  ;;  %497 = vmatprep.subr.bf16.mxu0 %v559_v12  ;;  %v579_v32 = vld [vmem:[%s739_s0] ss:$16 sps:$4 sm:$0xff]   ;;  %v581_v33 = vld [vmem:[%s739_s0 + $0x4] ss:$16 sps:$4 sm:$0xff]   ;;  %v582_v34 = vld [vmem:[%s739_s0 + $0x8] ss:$16 sps:$4 sm:$0xff]  }
   0xe   :  { %525 = vmatprep.subr.bf16.mxu1 %v560_v13  ;;  %v584_v35 = vld [vmem:[%s739_s0 + $0xc] ss:$16 sps:$4 sm:$0xff]   ;;  %350 = vmatprep.mubr.bf16.mxu0 %v581_v33 }
   0xf   :  { %398 = vmatprep.mubr.bf16.mxu1 %v584_v35 }
  0x10   :  { %498 = vmatpush3.bf16.msra.mxu0 %v561_v14 }
  0x11   :  { %526 = vmatpush3.bf16.msra.mxu1 %v562_v15  ;;  %499 = vmatprep.subr.bf16.mxu0 %v563_v16 }
  0x12   :  { %527 = vmatprep.subr.bf16.mxu1 %v564_v17 }
  0x14   :  { %500 = vmatpush3.bf16.msra.mxu0 %v565_v18 }
  0x15   :  { %528 = vmatpush3.bf16.msra.mxu1 %v566_v19  ;;  %501 = vmatprep.subr.bf16.mxu0 %v567_v20 }
  0x16   :  { %529 = vmatprep.subr.bf16.mxu1 %v568_v21 }
  0x18   :  { %502 = vmatpush3.bf16.msra.mxu0 %v569_v22 }
  0x19   :  { %530 = vmatpush3.bf16.msra.mxu1 %v570_v23  ;;  %503 = vmatprep.subr.bf16.mxu0 %v571_v24 }
  0x1a   :  { %531 = vmatprep.subr.bf16.mxu1 %v572_v25 }
  0x1c   :  { %504 = vmatpush3.bf16.msra.mxu0 %v573_v26 }
  0x1d   :  { %532 = vmatpush3.bf16.msra.mxu1 %v574_v27  ;;  %505 = vmatprep.subr.bf16.mxu0 %v575_v28 }
  0x1e   :  { %533 = vmatprep.subr.bf16.mxu1 %v576_v29 }
  0x20   :  { %506 = vmatpush3.bf16.msra.mxu0 %v577_v30 }
  0x21   :  { %534 = vmatpush3.bf16.msra.mxu1 %v578_v31 }
  0x23   :  { %351 = vmatmul.mubr.bf16.vlgmr.msra.gmra.mrb[0].mxu0 %v579_v32 }
  0x24   :  { %399 = vmatmul.mubr.bf16.vlgmr.msra.gmra.mrb[0].mxu1 %v582_v34  ;;  %358 = vmatprep.mubr.bf16.mxu0 %v450_v37 }
  0x25   :  { %406 = vmatprep.mubr.bf16.mxu1 %v452_v39 }
  0x2b   :  { %359 = vmatmul.mubr.bf16.gmra.mrb[4].mxu0 %v449_v40 }
  0x2c   :  { %407 = vmatmul.mubr.bf16.gmra.mrb[4].mxu1 %v451_v41 }
  0xf6   :  { %v507_v42 = vpop.f32.mrb[0].mxu0 }
  0xf7   :  { %v535_v43 = vpop.f32.mrb[0].mxu1  ;;  %v508_v45 = vpop.f32.mrb[1].mxu0 }
  0xf8   :  { %v509_v46 = vadd.f32 %v508_v45, %v507_v42  ;;  %v536_v47 = vpop.f32.mrb[1].mxu1  ;;  %v510_v48 = vpop.f32.mrb[2].mxu0 }
  0xf9   :  { %v537_v49 = vadd.f32 %v536_v47, %v535_v43  ;;  %v538_v50 = vpop.f32.mrb[2].mxu1  ;;  %v511_v51 = vpop.f32.mrb[3].mxu0 }
  0xfa   :  { %v353_v52 = vadd.f32 %v509_v46, %v444_v44  ;;  %v512_v53 = vadd.f32 %v511_v51, %v510_v48  ;;  %v539_v54 = vpop.f32.mrb[3].mxu1 }
  0xfb   :  { %v540_v55 = vadd.f32 %v539_v54, %v538_v50 }
  0xfc   :  { %v401_v56 = vadd.f32 %v537_v49, %v353_v52  ;;  %v356_v57 = vadd.f32 %v512_v53, %v444_v44 }
  0xfe   :  { %vm414_vm0 = vcmp.ge.f32.partialorder %v401_v56, 0.0  ;;  %v417_v58 = vmul.f32 0.01, %v401_v56  ;;  %v404_v59 = vadd.f32 %v540_v55, %v356_v57  ;;  %v513_v60 = vpop.f32.mrb[4].mxu0 }
  0xff   :  { %v541_v61 = vpop.f32.mrb[4].mxu1  ;;  %v514_v62 = vpop.f32.mrb[5].mxu0 }
 0x100   :  { %v420_v63 = vsel %vm414_vm0, %v401_v56, %v417_v58  ;;  %vm415_vm2 = vcmp.ge.f32.partialorder %v404_v59, 0.0  ;;  %v418_v0 = vmul.f32 0.01, %v404_v59  ;;  %v515_v1 = vadd.f32 %v514_v62, %v513_v60  ;;  %v542_v2 = vpop.f32.mrb[5].mxu1  ;;  %v516_v3 = vpop.f32.mrb[6].mxu0 }
 0x101   :  { %v488_v4 = vpack.c.bf16 %v420_v63, %v420_v63  ;;  %v543_v5 = vadd.f32 %v542_v2, %v541_v61  ;;  %v544_v6 = vpop.f32.mrb[6].mxu1  ;;  %v517_v7 = vpop.f32.mrb[7].mxu0 }
 0x102   :  { %v421_v8 = vsel %vm415_vm2, %v404_v59, %v418_v0  ;;  %v361_v9 = vadd.f32 %v515_v1, %v444_v44  ;;  %v545_v10 = vpop.f32.mrb[7].mxu1 }
 0x103   :  { %437 = vst.msk [vmem:[%s741_s3] sm:$0xf] %vm436_vm1, %v488_v4  ;;  %v489_v11 = vpack.c.bf16 %v421_v8, %v421_v8 }
 0x104   :  { %v409_v12 = vadd.f32 %v543_v5, %v361_v9 }
 0x105   :  { %438 = vst.msk [vmem:[%s741_s3 + $0x4] sm:$0xf] %vm436_vm1, %v489_v11 }
 0x106   :  { %vm416_vm3 = vcmp.ge.f32.partialorder %v409_v12, 0.0  ;;  %v419_v13 = vmul.f32 0.01, %v409_v12 }
 0x108   :  { %v422_v14 = vsel %vm416_vm3, %v409_v12, %v419_v13 }
 0x109   :  { %v490_v15 = vpack.c.bf16 %v422_v14, %v422_v14 }
 0x10b   :  { %439 = vst.msk [vmem:[%s741_s3 + $0x8] sm:$0xf] %vm436_vm1, %v490_v15 }

// kernel: _patchdis_forward_impl.9
= control target key start
LH: loop header
LB: loop body
LE: loop exit
PB: predicated region body
PF: predicated region fallthrough
CT: control target
= control target key end

     0   :  { %vm728_vm0 = vcmask 7168   ;;  %s1197_s1 = inlined_call_operand.vmem [shape: bf16[1024,1], index: 1, kind: input, shape index: {}]   ;;  %s1198_s0 = inlined_call_operand.vmem [shape: bf16[8,1024], index: 0, kind: input, shape index: {}]   ;;  %s1199_s2 = inlined_call_operand.<no memory space> [shape: f32[1,1], index: 2, kind: input, shape index: {}]   ;;  %s1200_s3 = inlined_call_operand.vmem [shape: f32[8,1], index: 3, kind: output, shape index: {}]  }
   0x1   :  { %v895_v0 = vld [vmem:[%s1197_s1 + $0x40] sm:$0xff]   ;;  %v899_v4 = vld [vmem:[%s1197_s1 + $0x48] sm:$0xff]   ;;  %v903_v8 = vld [vmem:[%s1197_s1 + $0x50] sm:$0xff]  }
   0x2   :  { %v896_v1 = vld [vmem:[%s1197_s1 + $0xc0] sm:$0xff]   ;;  %807 = vmatprep.subr.bf16.mxu0 %v895_v0  ;;  %v900_v5 = vld [vmem:[%s1197_s1 + $0xc8] sm:$0xff]   ;;  %v904_v9 = vld [vmem:[%s1197_s1 + $0xd0] sm:$0xff]  }
   0x3   :  { %v897_v2 = vld [vmem:[%s1197_s1] sm:$0xff]   ;;  %829 = vmatprep.subr.bf16.mxu1 %v896_v1  ;;  %v901_v6 = vld [vmem:[%s1197_s1 + $0x8] sm:$0xff]   ;;  %v905_v10 = vld [vmem:[%s1197_s1 + $0x10] sm:$0xff]  }
   0x4   :  { %v898_v3 = vld [vmem:[%s1197_s1 + $0x80] sm:$0xff]   ;;  %808 = vmatpush3.bf16.msra.mxu0 %v897_v2  ;;  %v902_v7 = vld [vmem:[%s1197_s1 + $0x88] sm:$0xff]   ;;  %v906_v11 = vld [vmem:[%s1197_s1 + $0x90] sm:$0xff]  }
   0x5   :  { %830 = vmatpush3.bf16.msra.mxu1 %v898_v3  ;;  %809 = vmatprep.subr.bf16.mxu0 %v899_v4  ;;  %v907_v12 = vld [vmem:[%s1197_s1 + $0x58] sm:$0xff]   ;;  %v911_v16 = vld [vmem:[%s1197_s1 + $0x60] sm:$0xff]   ;;  %v915_v20 = vld [vmem:[%s1197_s1 + $0x68] sm:$0xff]  }
   0x6   :  { %831 = vmatprep.subr.bf16.mxu1 %v900_v5  ;;  %v908_v13 = vld [vmem:[%s1197_s1 + $0xd8] sm:$0xff]   ;;  %v912_v17 = vld [vmem:[%s1197_s1 + $0xe0] sm:$0xff]   ;;  %v916_v21 = vld [vmem:[%s1197_s1 + $0xe8] sm:$0xff]  }
   0x7   :  { %v909_v14 = vld [vmem:[%s1197_s1 + $0x18] sm:$0xff]   ;;  %v913_v18 = vld [vmem:[%s1197_s1 + $0x20] sm:$0xff]   ;;  %v917_v22 = vld [vmem:[%s1197_s1 + $0x28] sm:$0xff]  }
   0x8   :  { %810 = vmatpush3.bf16.msra.mxu0 %v901_v6  ;;  %v910_v15 = vld [vmem:[%s1197_s1 + $0x98] sm:$0xff]   ;;  %v914_v19 = vld [vmem:[%s1197_s1 + $0xa0] sm:$0xff]   ;;  %v918_v23 = vld [vmem:[%s1197_s1 + $0xa8] sm:$0xff]  }
   0x9   :  { %832 = vmatpush3.bf16.msra.mxu1 %v902_v7  ;;  %811 = vmatprep.subr.bf16.mxu0 %v903_v8  ;;  %v919_v24 = vld [vmem:[%s1197_s1 + $0x70] sm:$0xff]   ;;  %v923_v28 = vld [vmem:[%s1197_s1 + $0x78] sm:$0xff]   ;;  %v17_v32 = vld [vmem:[%s1198_s0] sm:$0xff] }
   0xa   :  { %833 = vmatprep.subr.bf16.mxu1 %v904_v9  ;;  %v920_v25 = vld [vmem:[%s1197_s1 + $0xf0] sm:$0xff]   ;;  %v924_v29 = vld [vmem:[%s1197_s1 + $0xf8] sm:$0xff]   ;;  %v18_v33 = vld [vmem:[%s1198_s0 + $0x8] sm:$0xff]  ;;  %v735_v34 = vcombine.low %v17_v32, %v17_v32  ;;  %v736_v35 = vcombine.high %v17_v32, %v17_v32 }
   0xb   :  { %v921_v26 = vld [vmem:[%s1197_s1 + $0x30] sm:$0xff]   ;;  %v925_v30 = vld [vmem:[%s1197_s1 + $0x38] sm:$0xff]   ;;  %v737_v36 = vcombine.low %v18_v33, %v18_v33  ;;  %v738_v37 = vcombine.high %v18_v33, %v18_v33  ;;  %v931_v38 = vld [vmem:[%s1197_s1 + $0x140] sm:$0xff]  }
   0xc   :  { %812 = vmatpush3.bf16.msra.mxu0 %v905_v10  ;;  %v922_v27 = vld [vmem:[%s1197_s1 + $0xb0] sm:$0xff]   ;;  %v926_v31 = vld [vmem:[%s1197_s1 + $0xb8] sm:$0xff]   ;;  %v932_v39 = vld [vmem:[%s1197_s1 + $0x1c0] sm:$0xff]   ;;  %600 = vmatprep.mubr.bf16.mxu0 %v736_v35 }
   0xd   :  { %834 = vmatpush3.bf16.msra.mxu1 %v906_v11  ;;  %813 = vmatprep.subr.bf16.mxu0 %v907_v12  ;;  %v933_v40 = vld [vmem:[%s1197_s1 + $0x100] sm:$0xff]   ;;  %v935_v42 = vld [vmem:[%s1197_s1 + $0x148] sm:$0xff]   ;;  %v939_v46 = vld [vmem:[%s1197_s1 + $0x150] sm:$0xff]   ;;  %v8_v12 = vstv %s1199_s2 }
   0xe   :  { %835 = vmatprep.subr.bf16.mxu1 %v908_v13  ;;  %640 = vmatprep.mubr.bf16.mxu1 %v738_v37  ;;  %v934_v41 = vld [vmem:[%s1197_s1 + $0x180] sm:$0xff]   ;;  %v936_v43 = vld [vmem:[%s1197_s1 + $0x1c8] sm:$0xff]   ;;  %v940_v47 = vld [vmem:[%s1197_s1 + $0x1d0] sm:$0xff]   ;;  %9 = vst [vmem:[#allocation2] sm:$0x1] %v8_v12 }
   0xf   :  { %v937_v44 = vld [vmem:[%s1197_s1 + $0x108] sm:$0xff]   ;;  %v941_v48 = vld [vmem:[%s1197_s1 + $0x110] sm:$0xff]   ;;  %v943_v50 = vld [vmem:[%s1197_s1 + $0x158] sm:$0xff]  }
  0x10   :  { %814 = vmatpush3.bf16.msra.mxu0 %v909_v14  ;;  %v938_v45 = vld [vmem:[%s1197_s1 + $0x188] sm:$0xff]   ;;  %v942_v49 = vld [vmem:[%s1197_s1 + $0x190] sm:$0xff]   ;;  %v944_v51 = vld [vmem:[%s1197_s1 + $0x1d8] sm:$0xff]  }
  0x11   :  { %836 = vmatpush3.bf16.msra.mxu1 %v910_v15  ;;  %815 = vmatprep.subr.bf16.mxu0 %v911_v16  ;;  %v945_v52 = vld [vmem:[%s1197_s1 + $0x118] sm:$0xff]   ;;  %v947_v54 = vld [vmem:[%s1197_s1 + $0x160] sm:$0xff]   ;;  %v951_v58 = vld [vmem:[%s1197_s1 + $0x168] sm:$0xff]  }
  0x12   :  { %837 = vmatprep.subr.bf16.mxu1 %v912_v17  ;;  %v946_v53 = vld [vmem:[%s1197_s1 + $0x198] sm:$0xff]   ;;  %v948_v55 = vld [vmem:[%s1197_s1 + $0x1e0] sm:$0xff]   ;;  %v952_v59 = vld [vmem:[%s1197_s1 + $0x1e8] sm:$0xff]  }
  0x13   :  { %v949_v56 = vld [vmem:[%s1197_s1 + $0x120] sm:$0xff]   ;;  %v953_v60 = vld [vmem:[%s1197_s1 + $0x128] sm:$0xff]   ;;  %v955_v62 = vld [vmem:[%s1197_s1 + $0x170] sm:$0xff]  }
  0x14   :  { %816 = vmatpush3.bf16.msra.mxu0 %v913_v18  ;;  %v950_v57 = vld [vmem:[%s1197_s1 + $0x1a0] sm:$0xff]   ;;  %v954_v61 = vld [vmem:[%s1197_s1 + $0x1a8] sm:$0xff]   ;;  %v956_v63 = vld [vmem:[%s1197_s1 + $0x1f0] sm:$0xff]  }
  0x15   :  { %838 = vmatpush3.bf16.msra.mxu1 %v914_v19  ;;  %817 = vmatprep.subr.bf16.mxu0 %v915_v20  ;;  %v957_v0 = vld [vmem:[%s1197_s1 + $0x130] sm:$0xff]   ;;  %v959_v2 = vld [vmem:[%s1197_s1 + $0x178] sm:$0xff]   ;;  %v734_v15 = vld [vmem:[#allocation2] ss:$0 sm:$0xff] }
  0x16   :  { %839 = vmatprep.subr.bf16.mxu1 %v916_v21  ;;  %v958_v1 = vld [vmem:[%s1197_s1 + $0x1b0] sm:$0xff]   ;;  %v960_v3 = vld [vmem:[%s1197_s1 + $0x1f8] sm:$0xff]  }
  0x17   :  { %v961_v4 = vld [vmem:[%s1197_s1 + $0x138] sm:$0xff]   ;;  %v19_v6 = vld [vmem:[%s1198_s0 + $0x10] sm:$0xff] }
  0x18   :  { %818 = vmatpush3.bf16.msra.mxu0 %v917_v22  ;;  %v962_v5 = vld [vmem:[%s1197_s1 + $0x1b8] sm:$0xff]   ;;  %v739_v7 = vcombine.low %v19_v6, %v19_v6  ;;  %v740_v8 = vcombine.high %v19_v6, %v19_v6 }
  0x19   :  { %840 = vmatpush3.bf16.msra.mxu1 %v918_v23  ;;  %819 = vmatprep.subr.bf16.mxu0 %v919_v24  ;;  %v20_v9 = vld [vmem:[%s1198_s0 + $0x18] sm:$0xff] }
  0x1a   :  { %841 = vmatprep.subr.bf16.mxu1 %v920_v25  ;;  %v741_v10 = vcombine.low %v20_v9, %v20_v9  ;;  %v742_v11 = vcombine.high %v20_v9, %v20_v9 }
  0x1c   :  { %820 = vmatpush3.bf16.msra.mxu0 %v921_v26 }
  0x1d   :  { %842 = vmatpush3.bf16.msra.mxu1 %v922_v27  ;;  %821 = vmatprep.subr.bf16.mxu0 %v923_v28 }
  0x1e   :  { %843 = vmatprep.subr.bf16.mxu1 %v924_v29 }
  0x20   :  { %822 = vmatpush3.bf16.msra.mxu0 %v925_v30 }
  0x21   :  { %844 = vmatpush3.bf16.msra.mxu1 %v926_v31  ;;  %851 = vmatprep.subr.bf16.mxu0 %v931_v38 }
  0x22   :  { %873 = vmatprep.subr.bf16.mxu1 %v932_v39 }
  0x23   :  { %601 = vmatmul.mubr.bf16.vlgmr.msra.gmra.mrb[0].mxu0 %v735_v34 }
  0x24   :  { %641 = vmatmul.mubr.bf16.vlgmr.msra.gmra.mrb[0].mxu1 %v737_v36  ;;  %852 = vmatpush3.bf16.msra.mxu0 %v933_v40 }
  0x25   :  { %874 = vmatpush3.bf16.msra.mxu1 %v934_v41  ;;  %853 = vmatprep.subr.bf16.mxu0 %v935_v42 }
  0x26   :  { %875 = vmatprep.subr.bf16.mxu1 %v936_v43  ;;  %680 = vmatprep.mubr.bf16.mxu0 %v740_v8 }
  0x27   :  { %720 = vmatprep.mubr.bf16.mxu1 %v742_v11 }
  0x28   :  { %854 = vmatpush3.bf16.msra.mxu0 %v937_v44 }
  0x29   :  { %876 = vmatpush3.bf16.msra.mxu1 %v938_v45  ;;  %855 = vmatprep.subr.bf16.mxu0 %v939_v46 }
  0x2a   :  { %877 = vmatprep.subr.bf16.mxu1 %v940_v47 }
  0x2c   :  { %856 = vmatpush3.bf16.msra.mxu0 %v941_v48 }
  0x2d   :  { %878 = vmatpush3.bf16.msra.mxu1 %v942_v49  ;;  %857 = vmatprep.subr.bf16.mxu0 %v943_v50 }
  0x2e   :  { %879 = vmatprep.subr.bf16.mxu1 %v944_v51 }
  0x30   :  { %858 = vmatpush3.bf16.msra.mxu0 %v945_v52 }
  0x31   :  { %880 = vmatpush3.bf16.msra.mxu1 %v946_v53  ;;  %859 = vmatprep.subr.bf16.mxu0 %v947_v54 }
  0x32   :  { %881 = vmatprep.subr.bf16.mxu1 %v948_v55 }
  0x34   :  { %860 = vmatpush3.bf16.msra.mxu0 %v949_v56 }
  0x35   :  { %882 = vmatpush3.bf16.msra.mxu1 %v950_v57  ;;  %861 = vmatprep.subr.bf16.mxu0 %v951_v58 }
  0x36   :  { %883 = vmatprep.subr.bf16.mxu1 %v952_v59 }
  0x38   :  { %862 = vmatpush3.bf16.msra.mxu0 %v953_v60 }
  0x39   :  { %884 = vmatpush3.bf16.msra.mxu1 %v954_v61  ;;  %863 = vmatprep.subr.bf16.mxu0 %v955_v62 }
  0x3a   :  { %885 = vmatprep.subr.bf16.mxu1 %v956_v63 }
  0x3c   :  { %864 = vmatpush3.bf16.msra.mxu0 %v957_v0 }
  0x3d   :  { %886 = vmatpush3.bf16.msra.mxu1 %v958_v1  ;;  %865 = vmatprep.subr.bf16.mxu0 %v959_v2 }
  0x3e   :  { %887 = vmatprep.subr.bf16.mxu1 %v960_v3 }
  0x40   :  { %866 = vmatpush3.bf16.msra.mxu0 %v961_v4 }
  0x41   :  { %888 = vmatpush3.bf16.msra.mxu1 %v962_v5 }
  0x43   :  { %681 = vmatmul.mubr.bf16.vlgmr.msra.gmra.mrb[4].mxu0 %v739_v7 }
  0x44   :  { %721 = vmatmul.mubr.bf16.vlgmr.msra.gmra.mrb[4].mxu1 %v741_v10 }
  0xf6   :  { %v823_v13 = vpop.f32.mrb[0].mxu0 }
  0xf7   :  { %v845_v14 = vpop.f32.mrb[0].mxu1  ;;  %v824_v16 = vpop.f32.mrb[1].mxu0 }
  0xf8   :  { %v846_v17 = vpop.f32.mrb[1].mxu1  ;;  %v825_v18 = vadd.f32 %v824_v16, %v823_v13  ;;  %v826_v20 = vpop.f32.mrb[2].mxu0 }
  0xf9   :  { %v847_v19 = vadd.f32 %v846_v17, %v845_v14  ;;  %v848_v21 = vpop.f32.mrb[2].mxu1  ;;  %v827_v22 = vpop.f32.mrb[3].mxu0 }
  0xfa   :  { %v849_v23 = vpop.f32.mrb[3].mxu1  ;;  %v603_v24 = vadd.f32 %v825_v18, %v734_v15 }
  0xfc   :  { %v643_v25 = vadd.f32 %v847_v19, %v603_v24 }
 0x116   :  { %v867_v26 = vpop.f32.mrb[4].mxu0 }
 0x117   :  { %v889_v27 = vpop.f32.mrb[4].mxu1  ;;  %v868_v28 = vpop.f32.mrb[5].mxu0 }
 0x118   :  { %v890_v29 = vpop.f32.mrb[5].mxu1  ;;  %v869_v30 = vadd.f32 %v868_v28, %v867_v26  ;;  %v870_v32 = vpop.f32.mrb[6].mxu0 }
 0x119   :  { %v891_v31 = vadd.f32 %v890_v29, %v889_v27  ;;  %v892_v33 = vpop.f32.mrb[6].mxu1  ;;  %v871_v34 = vpop.f32.mrb[7].mxu0 }
 0x11a   :  { %v893_v35 = vpop.f32.mrb[7].mxu1  ;;  %v683_v36 = vadd.f32 %v869_v30, %v643_v25 }
 0x11c   :  { %v723_v37 = vadd.f32 %v891_v31, %v683_v36 }
 0x11e   :  { %729 = vst.msk [vmem:[%s1200_s3] sm:$0xff] %vm728_vm0, %v723_v37 }

</bundles_post_ra>
